<compile_context>
chip_gen: v7x
topology: tpu7x:2x2x1
jax: 0.10.0
libtpu: 0.0.40
codegen_flags: <defaults>
</compile_context>

<pallas_src>
import math
import functools

import jax
import jax.numpy as jnp
from jax.experimental import pallas as pl
from jax.experimental.pallas import tpu as pltpu


def _layer_norm(x, gamma, beta, eps=1e-5):
    # x: (S, D) f32; gamma/beta: (1, D) f32. Biased variance, like nn.LayerNorm (eps=1e-5).
    mean = jnp.mean(x, axis=-1, keepdims=True)
    var = jnp.mean((x - mean) ** 2, axis=-1, keepdims=True)
    return (x - mean) * jax.lax.rsqrt(var + eps) * gamma + beta


def decoder_kernel(x_ref, bias_ref,
                   wqkv_ref, bqkv_ref, wo_ref, bo_ref,
                   w1_ref, b1_ref, w2_ref, b2_ref,
                   g1_ref, be1_ref, g2_ref, be2_ref,
                   out_ref,
                   *, num_heads):
    x = x_ref[0].astype(jnp.float32)          # (S, D) residual path in f32
    x_bf = x.astype(jnp.bfloat16)             # bf16 activations for the MXU
    bias = bias_ref[0].astype(jnp.float32)    # (S, S) additive mask bias (0 / -1e9)

    S, D = x.shape
    head_dim = D // num_heads
    scale = 1.0 / math.sqrt(head_dim)

    # ---- multi-headed self attention ----
    # Fused QKV projection: one (S, D) @ (D, 3D) bf16 matmul, f32 accumulation.
    qkv = jnp.dot(x_bf, wqkv_ref[...], preferred_element_type=jnp.float32) + bqkv_ref[...]
    qkv = qkv.astype(jnp.bfloat16)
    q = qkv[:, :D]
    k = qkv[:, D:2 * D]
    v = qkv[:, 2 * D:]

    wo = wo_ref[...]                          # (D, D) bf16, loaded once
    attn_out = jnp.zeros((S, D), jnp.float32)
    for h in range(num_heads):
        lo = h * head_dim
        qh = q[:, lo:lo + head_dim]           # (S, hd) lane-aligned static slices
        kh = k[:, lo:lo + head_dim]
        vh = v[:, lo:lo + head_dim]

        # scores = qh @ kh^T (contraction over head_dim), f32 accumulate on the MXU.
        s = jax.lax.dot_general(qh, kh, (((1,), (1,)), ((), ())),
                                preferred_element_type=jnp.float32)
        s = s * scale + bias                  # additive mask bias instead of where/select
        m = jnp.max(s, axis=-1, keepdims=True)
        p = jnp.exp(s - m)
        denom = jnp.sum(p, axis=-1, keepdims=True)
        p = (p * pl.reciprocal(denom, approx=True)).astype(jnp.bfloat16)

        ctx = jnp.dot(p, vh, preferred_element_type=jnp.float32)        # (S, hd)
        # Accumulate this head's contribution to the output projection directly
        # (no concatenate of all heads).
        attn_out += jnp.dot(ctx.astype(jnp.bfloat16), wo[lo:lo + head_dim, :],
                            preferred_element_type=jnp.float32)
    attn_out = attn_out + bo_ref[...]

    # ---- residual + LayerNorm 1 (f32) ----
    r1 = x + attn_out
    n1 = _layer_norm(r1, g1_ref[...], be1_ref[...])

    # ---- feed forward: Linear -> ReLU -> Linear (bf16 matmuls, f32 accumulate) ----
    h1 = jnp.dot(n1.astype(jnp.bfloat16), w1_ref[...],
                 preferred_element_type=jnp.float32) + b1_ref[...]
    h1 = jnp.maximum(h1, 0.0).astype(jnp.bfloat16)
    ff = jnp.dot(h1, w2_ref[...], preferred_element_type=jnp.float32) + b2_ref[...]

    # ---- residual + LayerNorm 2 (f32) ----
    r2 = n1 + ff
    out = _layer_norm(r2, g2_ref[...], be2_ref[...])

    # TODO(synk): dropout is only active in training mode; eval-mode forward has no dropout.
    out_ref[0] = out.astype(out_ref.dtype)


def decoder_forward(x, mask, params, *, num_heads):
    B, S, D = x.shape
    FF = params["w1"].shape[-1]

    # Fold the {0,1} attention mask into a bf16 additive bias once, outside the kernel.
    # Masked positions get -1e9 added to their pre-softmax scores, matching the reference
    # `where(mask > 0, scores, -1e9)` after softmax, and halving (B,S,S) HBM->VMEM traffic.
    bias = jnp.where(mask > 0, 0.0, -1e9).astype(jnp.bfloat16)

    # Fuse the Q/K/V projections into a single (D, 3D) weight / (1, 3D) bias.
    wqkv = jnp.concatenate([params["wq"], params["wk"], params["wv"]], axis=1)
    bqkv = jnp.concatenate([params["bq"], params["bk"], params["bv"]], axis=1)

    full2d = lambda shape: pl.BlockSpec(shape, lambda b: (0, 0))
    per_batch3d = lambda shape: pl.BlockSpec(shape, lambda b: (b, 0, 0))

    in_specs = [
        per_batch3d((1, S, D)),                   # x
        per_batch3d((1, S, S)),                   # additive mask bias (bf16)
        full2d((D, 3 * D)), full2d((1, 3 * D)),   # wqkv, bqkv
        full2d((D, D)), full2d((1, D)),           # wo, bo
        full2d((D, FF)), full2d((1, FF)),         # w1, b1
        full2d((FF, D)), full2d((1, D)),          # w2, b2
        full2d((1, D)), full2d((1, D)),           # gamma1, beta1
        full2d((1, D)), full2d((1, D)),           # gamma2, beta2
    ]

    kernel = functools.partial(decoder_kernel, num_heads=num_heads)

    return pl.pallas_call(
        kernel,
        out_shape=jax.ShapeDtypeStruct((B, S, D), x.dtype),
        grid_spec=pltpu.PrefetchScalarGridSpec(
            num_scalar_prefetch=0,
            grid=(B,),
            in_specs=in_specs,
            out_specs=per_batch3d((1, S, D)),
        ),
        compiler_params=pltpu.CompilerParams(
            dimension_semantics=("parallel",),
            vmem_limit_bytes=32 * 1024 * 1024,
        ),
    )(x, bias, wqkv, bqkv,
      params["wo"], params["bo"],
      params["w1"], params["b1"], params["w2"], params["b2"],
      params["g1"], params["be1"], params["g2"], params["be2"])


def init_params(key, D, FF):
    ks = jax.random.split(key, 6)
    s = 0.02
    wdt = jnp.bfloat16  # weights stored as bf16 in HBM (native MXU input dtype)
    return {
        "wq": (s * jax.random.normal(ks[0], (D, D), jnp.float32)).astype(wdt),
        "wk": (s * jax.random.normal(ks[1], (D, D), jnp.float32)).astype(wdt),
        "wv": (s * jax.random.normal(ks[2], (D, D), jnp.float32)).astype(wdt),
        "wo": (s * jax.random.normal(ks[3], (D, D), jnp.float32)).astype(wdt),
        "w1": (s * jax.random.normal(ks[4], (D, FF), jnp.float32)).astype(wdt),
        "w2": (s * jax.random.normal(ks[5], (FF, D), jnp.float32)).astype(wdt),
        "bq": jnp.zeros((1, D), jnp.float32),
        "bk": jnp.zeros((1, D), jnp.float32),
        "bv": jnp.zeros((1, D), jnp.float32),
        "bo": jnp.zeros((1, D), jnp.float32),
        "b1": jnp.zeros((1, FF), jnp.float32),
        "b2": jnp.zeros((1, D), jnp.float32),
        "g1": jnp.ones((1, D), jnp.float32),
        "be1": jnp.zeros((1, D), jnp.float32),
        "g2": jnp.ones((1, D), jnp.float32),
        "be2": jnp.zeros((1, D), jnp.float32),
    }


if __name__ == "__main__":
    # Small but lane-dense shapes: D, FF and head_dim = D // H are multiples of 128.
    B, S, D, H, FF = 2, 16, 256, 2, 512
    key = jax.random.PRNGKey(0)
    kx, kp = jax.random.split(key)

    x = jax.random.normal(kx, (B, S, D), jnp.float32)
    # causal mask: 1 = attend, 0 = masked
    causal = jnp.tril(jnp.ones((S, S), jnp.float32))
    mask = jnp.broadcast_to(causal, (B, S, S))

    params = init_params(kp, D, FF)

    out = decoder_forward(x, mask, params, num_heads=H)
    out = jax.block_until_ready(out)
    assert out.shape == (B, S, D)
    assert jnp.all(jnp.isfinite(out))
    print("KERNEL_OK")
</pallas_src>

<mosaic_0001>
module attributes {stable_mosaic.version = 11 : i64} {
  func.func @decoder_kernel(%arg0: i32, %arg1: memref<1x16x256xf32, #tpu.memory_space<vmem>>, %arg2: memref<1x16x16xbf16, #tpu.memory_space<vmem>>, %arg3: memref<256x768xbf16, #tpu.memory_space<vmem>>, %arg4: memref<1x768xf32, #tpu.memory_space<vmem>>, %arg5: memref<256x256xbf16, #tpu.memory_space<vmem>>, %arg6: memref<1x256xf32, #tpu.memory_space<vmem>>, %arg7: memref<256x512xbf16, #tpu.memory_space<vmem>>, %arg8: memref<1x512xf32, #tpu.memory_space<vmem>>, %arg9: memref<512x256xbf16, #tpu.memory_space<vmem>>, %arg10: memref<1x256xf32, #tpu.memory_space<vmem>>, %arg11: memref<1x256xf32, #tpu.memory_space<vmem>>, %arg12: memref<1x256xf32, #tpu.memory_space<vmem>>, %arg13: memref<1x256xf32, #tpu.memory_space<vmem>>, %arg14: memref<1x256xf32, #tpu.memory_space<vmem>>, %arg15: memref<1x16x256xf32, #tpu.memory_space<vmem>>) attributes {dimension_semantics = [#tpu.dimension_semantics<parallel>], iteration_bounds = array<i64: 2>, scalar_prefetch = 0 : i64, scratch_operands = 0 : i64, tpu.core_type = #tpu.core_type<tc>, window_params = [{transform_indices = @transform_0, window_bounds = array<i64: 1, 16, 256>}, {transform_indices = @transform_1, window_bounds = array<i64: 1, 16, 16>}, {pipeline_mode = #tpu.pipeline_mode<synchronous>, transform_indices = @transform_2, window_bounds = array<i64: 256, 768>}, {pipeline_mode = #tpu.pipeline_mode<synchronous>, transform_indices = @transform_3, window_bounds = array<i64: 1, 768>}, {pipeline_mode = #tpu.pipeline_mode<synchronous>, transform_indices = @transform_4, window_bounds = array<i64: 256, 256>}, {pipeline_mode = #tpu.pipeline_mode<synchronous>, transform_indices = @transform_5, window_bounds = array<i64: 1, 256>}, {pipeline_mode = #tpu.pipeline_mode<synchronous>, transform_indices = @transform_6, window_bounds = array<i64: 256, 512>}, {pipeline_mode = #tpu.pipeline_mode<synchronous>, transform_indices = @transform_7, window_bounds = array<i64: 1, 512>}, {pipeline_mode = #tpu.pipeline_mode<synchronous>, transform_indices = @transform_8, window_bounds = array<i64: 512, 256>}, {pipeline_mode = #tpu.pipeline_mode<synchronous>, transform_indices = @transform_9, window_bounds = array<i64: 1, 256>}, {pipeline_mode = #tpu.pipeline_mode<synchronous>, transform_indices = @transform_10, window_bounds = array<i64: 1, 256>}, {pipeline_mode = #tpu.pipeline_mode<synchronous>, transform_indices = @transform_11, window_bounds = array<i64: 1, 256>}, {pipeline_mode = #tpu.pipeline_mode<synchronous>, transform_indices = @transform_12, window_bounds = array<i64: 1, 256>}, {pipeline_mode = #tpu.pipeline_mode<synchronous>, transform_indices = @transform_13, window_bounds = array<i64: 1, 256>}, {transform_indices = @transform_14, window_bounds = array<i64: 1, 16, 256>}]} {
    %c0 = arith.constant 0 : index
    %c0_0 = arith.constant 0 : index
    %c0_1 = arith.constant 0 : index
    %0 = vector.load %arg1[%c0, %c0_0, %c0_1] : memref<1x16x256xf32, #tpu.memory_space<vmem>>, vector<1x16x256xf32>
    %1 = vector.shape_cast %0 : vector<1x16x256xf32> to vector<16x256xf32>
    %2 = arith.truncf %1 : vector<16x256xf32> to vector<16x256xbf16>
    %c0_2 = arith.constant 0 : index
    %c0_3 = arith.constant 0 : index
    %c0_4 = arith.constant 0 : index
    %3 = vector.load %arg2[%c0_2, %c0_3, %c0_4] : memref<1x16x16xbf16, #tpu.memory_space<vmem>>, vector<1x16x16xbf16>
    %4 = vector.shape_cast %3 : vector<1x16x16xbf16> to vector<16x16xbf16>
    %5 = arith.extf %4 : vector<16x16xbf16> to vector<16x16xf32>
    %c0_5 = arith.constant 0 : index
    %c0_6 = arith.constant 0 : index
    %6 = vector.load %arg3[%c0_5, %c0_6] : memref<256x768xbf16, #tpu.memory_space<vmem>>, vector<256x768xbf16>
    %cst = arith.constant dense<0.000000e+00> : vector<16x768xf32>
    %7 = tpu.matmul %2, %6, %cst {dimension_numbers = #tpu.dot_dimension_numbers<[1], [0], [0], [1], [0, 0, 1, 1], [], []>} : vector<16x256xbf16>, vector<256x768xbf16>, vector<16x768xf32> -> vector<16x768xf32>
    %c0_7 = arith.constant 0 : index
    %c0_8 = arith.constant 0 : index
    %8 = vector.load %arg4[%c0_7, %c0_8] : memref<1x768xf32, #tpu.memory_space<vmem>>, vector<1x768xf32>
    %9 = vector.broadcast %8 : vector<1x768xf32> to vector<16x768xf32>
    %10 = arith.addf %7, %9 : vector<16x768xf32>
    %11 = arith.truncf %10 : vector<16x768xf32> to vector<16x768xbf16>
    %12 = vector.extract_strided_slice %11 {offsets = [0, 0], sizes = [16, 256], strides = [1, 1]} : vector<16x768xbf16> to vector<16x256xbf16>
    %13 = vector.extract_strided_slice %11 {offsets = [0, 256], sizes = [16, 256], strides = [1, 1]} : vector<16x768xbf16> to vector<16x256xbf16>
    %14 = vector.extract_strided_slice %11 {offsets = [0, 512], sizes = [16, 256], strides = [1, 1]} : vector<16x768xbf16> to vector<16x256xbf16>
    %c0_9 = arith.constant 0 : index
    %c0_10 = arith.constant 0 : index
    %15 = vector.load %arg5[%c0_9, %c0_10] : memref<256x256xbf16, #tpu.memory_space<vmem>>, vector<256x256xbf16>
    %cst_11 = arith.constant 0.000000e+00 : f32
    %16 = vector.broadcast %cst_11 : f32 to vector<16x256xf32>
    %17 = vector.extract_strided_slice %12 {offsets = [0, 0], sizes = [16, 128], strides = [1, 1]} : vector<16x256xbf16> to vector<16x128xbf16>
    %18 = vector.extract_strided_slice %13 {offsets = [0, 0], sizes = [16, 128], strides = [1, 1]} : vector<16x256xbf16> to vector<16x128xbf16>
    %19 = vector.extract_strided_slice %14 {offsets = [0, 0], sizes = [16, 128], strides = [1, 1]} : vector<16x256xbf16> to vector<16x128xbf16>
    %cst_12 = arith.constant dense<0.000000e+00> : vector<16x16xf32>
    %20 = tpu.matmul %17, %18, %cst_12 {dimension_numbers = #tpu.dot_dimension_numbers<[1], [1], [0], [0], [0, 0, 1, 0], [], []>} : vector<16x128xbf16>, vector<16x128xbf16>, vector<16x16xf32> -> vector<16x16xf32>
    %cst_13 = arith.constant 0.0883883461 : f32
    %21 = vector.broadcast %cst_13 : f32 to vector<16x16xf32>
    %22 = arith.mulf %20, %21 : vector<16x16xf32>
    %23 = arith.addf %22, %5 : vector<16x16xf32>
    %cst_14 = arith.constant dense<0xFF800000> : vector<16xf32>
    %24 = vector.multi_reduction <maximumf>, %23, %cst_14 [1] : vector<16x16xf32> to vector<16xf32>
    %25 = vector.shape_cast %24 : vector<16xf32> to vector<16x1xf32>
    %26 = vector.broadcast %25 : vector<16x1xf32> to vector<16x16xf32>
    %27 = arith.subf %23, %26 : vector<16x16xf32>
    %28 = math.exp %27 : vector<16x16xf32>
    %cst_15 = arith.constant dense<0.000000e+00> : vector<16xf32>
    %29 = vector.multi_reduction <add>, %28, %cst_15 [1] : vector<16x16xf32> to vector<16xf32>
    %30 = vector.shape_cast %29 : vector<16xf32> to vector<16x1xf32>
    %31 = tpu.reciprocal %30 {approx = true} : vector<16x1xf32> -> vector<16x1xf32>
    %32 = vector.broadcast %31 : vector<16x1xf32> to vector<16x16xf32>
    %33 = arith.mulf %28, %32 : vector<16x16xf32>
    %34 = arith.truncf %33 : vector<16x16xf32> to vector<16x16xbf16>
    %cst_16 = arith.constant dense<0.000000e+00> : vector<16x128xf32>
    %35 = tpu.matmul %34, %19, %cst_16 {dimension_numbers = #tpu.dot_dimension_numbers<[1], [0], [0], [1], [0, 0, 1, 1], [], []>} : vector<16x16xbf16>, vector<16x128xbf16>, vector<16x128xf32> -> vector<16x128xf32>
    %36 = arith.truncf %35 : vector<16x128xf32> to vector<16x128xbf16>
    %37 = vector.extract_strided_slice %15 {offsets = [0, 0], sizes = [128, 256], strides = [1, 1]} : vector<256x256xbf16> to vector<128x256xbf16>
    %cst_17 = arith.constant dense<0.000000e+00> : vector<16x256xf32>
    %38 = tpu.matmul %36, %37, %cst_17 {dimension_numbers = #tpu.dot_dimension_numbers<[1], [0], [0], [1], [0, 0, 1, 1], [], []>} : vector<16x128xbf16>, vector<128x256xbf16>, vector<16x256xf32> -> vector<16x256xf32>
    %39 = arith.addf %16, %38 : vector<16x256xf32>
    %40 = vector.extract_strided_slice %12 {offsets = [0, 128], sizes = [16, 128], strides = [1, 1]} : vector<16x256xbf16> to vector<16x128xbf16>
    %41 = vector.extract_strided_slice %13 {offsets = [0, 128], sizes = [16, 128], strides = [1, 1]} : vector<16x256xbf16> to vector<16x128xbf16>
    %42 = vector.extract_strided_slice %14 {offsets = [0, 128], sizes = [16, 128], strides = [1, 1]} : vector<16x256xbf16> to vector<16x128xbf16>
    %cst_18 = arith.constant dense<0.000000e+00> : vector<16x16xf32>
    %43 = tpu.matmul %40, %41, %cst_18 {dimension_numbers = #tpu.dot_dimension_numbers<[1], [1], [0], [0], [0, 0, 1, 0], [], []>} : vector<16x128xbf16>, vector<16x128xbf16>, vector<16x16xf32> -> vector<16x16xf32>
    %cst_19 = arith.constant 0.0883883461 : f32
    %44 = vector.broadcast %cst_19 : f32 to vector<16x16xf32>
    %45 = arith.mulf %43, %44 : vector<16x16xf32>
    %46 = arith.addf %45, %5 : vector<16x16xf32>
    %cst_20 = arith.constant dense<0xFF800000> : vector<16xf32>
    %47 = vector.multi_reduction <maximumf>, %46, %cst_20 [1] : vector<16x16xf32> to vector<16xf32>
    %48 = vector.shape_cast %47 : vector<16xf32> to vector<16x1xf32>
    %49 = vector.broadcast %48 : vector<16x1xf32> to vector<16x16xf32>
    %50 = arith.subf %46, %49 : vector<16x16xf32>
    %51 = math.exp %50 : vector<16x16xf32>
    %cst_21 = arith.constant dense<0.000000e+00> : vector<16xf32>
    %52 = vector.multi_reduction <add>, %51, %cst_21 [1] : vector<16x16xf32> to vector<16xf32>
    %53 = vector.shape_cast %52 : vector<16xf32> to vector<16x1xf32>
    %54 = tpu.reciprocal %53 {approx = true} : vector<16x1xf32> -> vector<16x1xf32>
    %55 = vector.broadcast %54 : vector<16x1xf32> to vector<16x16xf32>
    %56 = arith.mulf %51, %55 : vector<16x16xf32>
    %57 = arith.truncf %56 : vector<16x16xf32> to vector<16x16xbf16>
    %cst_22 = arith.constant dense<0.000000e+00> : vector<16x128xf32>
    %58 = tpu.matmul %57, %42, %cst_22 {dimension_numbers = #tpu.dot_dimension_numbers<[1], [0], [0], [1], [0, 0, 1, 1], [], []>} : vector<16x16xbf16>, vector<16x128xbf16>, vector<16x128xf32> -> vector<16x128xf32>
    %59 = arith.truncf %58 : vector<16x128xf32> to vector<16x128xbf16>
    %60 = vector.extract_strided_slice %15 {offsets = [128, 0], sizes = [128, 256], strides = [1, 1]} : vector<256x256xbf16> to vector<128x256xbf16>
    %cst_23 = arith.constant dense<0.000000e+00> : vector<16x256xf32>
    %61 = tpu.matmul %59, %60, %cst_23 {dimension_numbers = #tpu.dot_dimension_numbers<[1], [0], [0], [1], [0, 0, 1, 1], [], []>} : vector<16x128xbf16>, vector<128x256xbf16>, vector<16x256xf32> -> vector<16x256xf32>
    %62 = arith.addf %39, %61 : vector<16x256xf32>
    %c0_24 = arith.constant 0 : index
    %c0_25 = arith.constant 0 : index
    %63 = vector.load %arg6[%c0_24, %c0_25] : memref<1x256xf32, #tpu.memory_space<vmem>>, vector<1x256xf32>
    %64 = vector.broadcast %63 : vector<1x256xf32> to vector<16x256xf32>
    %65 = arith.addf %62, %64 : vector<16x256xf32>
    %66 = arith.addf %1, %65 : vector<16x256xf32>
    %c0_26 = arith.constant 0 : index
    %c0_27 = arith.constant 0 : index
    %67 = vector.load %arg11[%c0_26, %c0_27] : memref<1x256xf32, #tpu.memory_space<vmem>>, vector<1x256xf32>
    %c0_28 = arith.constant 0 : index
    %c0_29 = arith.constant 0 : index
    %68 = vector.load %arg12[%c0_28, %c0_29] : memref<1x256xf32, #tpu.memory_space<vmem>>, vector<1x256xf32>
    %cst_30 = arith.constant dense<0.000000e+00> : vector<16xf32>
    %69 = vector.multi_reduction <add>, %66, %cst_30 [1] : vector<16x256xf32> to vector<16xf32>
    %70 = vector.shape_cast %69 : vector<16xf32> to vector<16x1xf32>
    %cst_31 = arith.constant 2.560000e+02 : f32
    %71 = vector.broadcast %cst_31 : f32 to vector<16x1xf32>
    %72 = arith.divf %70, %71 : vector<16x1xf32>
    %73 = vector.broadcast %72 : vector<16x1xf32> to vector<16x256xf32>
    %74 = arith.subf %66, %73 : vector<16x256xf32>
    %75 = arith.mulf %74, %74 : vector<16x256xf32>
    %cst_32 = arith.constant dense<0.000000e+00> : vector<16xf32>
    %76 = vector.multi_reduction <add>, %75, %cst_32 [1] : vector<16x256xf32> to vector<16xf32>
    %77 = vector.shape_cast %76 : vector<16xf32> to vector<16x1xf32>
    %cst_33 = arith.constant 2.560000e+02 : f32
    %78 = vector.broadcast %cst_33 : f32 to vector<16x1xf32>
    %79 = arith.divf %77, %78 : vector<16x1xf32>
    %80 = vector.broadcast %72 : vector<16x1xf32> to vector<16x256xf32>
    %81 = arith.subf %66, %80 : vector<16x256xf32>
    %cst_34 = arith.constant 9.99999974E-6 : f32
    %82 = vector.broadcast %cst_34 : f32 to vector<16x1xf32>
    %83 = arith.addf %79, %82 : vector<16x1xf32>
    %84 = math.rsqrt %83 : vector<16x1xf32>
    %85 = vector.broadcast %84 : vector<16x1xf32> to vector<16x256xf32>
    %86 = arith.mulf %81, %85 : vector<16x256xf32>
    %87 = vector.broadcast %67 : vector<1x256xf32> to vector<16x256xf32>
    %88 = arith.mulf %86, %87 : vector<16x256xf32>
    %89 = vector.broadcast %68 : vector<1x256xf32> to vector<16x256xf32>
    %90 = arith.addf %88, %89 : vector<16x256xf32>
    %91 = arith.truncf %90 : vector<16x256xf32> to vector<16x256xbf16>
    %c0_35 = arith.constant 0 : index
    %c0_36 = arith.constant 0 : index
    %92 = vector.load %arg7[%c0_35, %c0_36] : memref<256x512xbf16, #tpu.memory_space<vmem>>, vector<256x512xbf16>
    %cst_37 = arith.constant dense<0.000000e+00> : vector<16x512xf32>
    %93 = tpu.matmul %91, %92, %cst_37 {dimension_numbers = #tpu.dot_dimension_numbers<[1], [0], [0], [1], [0, 0, 1, 1], [], []>} : vector<16x256xbf16>, vector<256x512xbf16>, vector<16x512xf32> -> vector<16x512xf32>
    %c0_38 = arith.constant 0 : index
    %c0_39 = arith.constant 0 : index
    %94 = vector.load %arg8[%c0_38, %c0_39] : memref<1x512xf32, #tpu.memory_space<vmem>>, vector<1x512xf32>
    %95 = vector.broadcast %94 : vector<1x512xf32> to vector<16x512xf32>
    %96 = arith.addf %93, %95 : vector<16x512xf32>
    %cst_40 = arith.constant 0.000000e+00 : f32
    %97 = vector.broadcast %cst_40 : f32 to vector<16x512xf32>
    %98 = arith.maximumf %96, %97 : vector<16x512xf32>
    %99 = arith.truncf %98 : vector<16x512xf32> to vector<16x512xbf16>
    %c0_41 = arith.constant 0 : index
    %c0_42 = arith.constant 0 : index
    %100 = vector.load %arg9[%c0_41, %c0_42] : memref<512x256xbf16, #tpu.memory_space<vmem>>, vector<512x256xbf16>
    %cst_43 = arith.constant dense<0.000000e+00> : vector<16x256xf32>
    %101 = tpu.matmul %99, %100, %cst_43 {dimension_numbers = #tpu.dot_dimension_numbers<[1], [0], [0], [1], [0, 0, 1, 1], [], []>} : vector<16x512xbf16>, vector<512x256xbf16>, vector<16x256xf32> -> vector<16x256xf32>
    %c0_44 = arith.constant 0 : index
    %c0_45 = arith.constant 0 : index
    %102 = vector.load %arg10[%c0_44, %c0_45] : memref<1x256xf32, #tpu.memory_space<vmem>>, vector<1x256xf32>
    %103 = vector.broadcast %102 : vector<1x256xf32> to vector<16x256xf32>
    %104 = arith.addf %101, %103 : vector<16x256xf32>
    %105 = arith.addf %90, %104 : vector<16x256xf32>
    %c0_46 = arith.constant 0 : index
    %c0_47 = arith.constant 0 : index
    %106 = vector.load %arg13[%c0_46, %c0_47] : memref<1x256xf32, #tpu.memory_space<vmem>>, vector<1x256xf32>
    %c0_48 = arith.constant 0 : index
    %c0_49 = arith.constant 0 : index
    %107 = vector.load %arg14[%c0_48, %c0_49] : memref<1x256xf32, #tpu.memory_space<vmem>>, vector<1x256xf32>
    %cst_50 = arith.constant dense<0.000000e+00> : vector<16xf32>
    %108 = vector.multi_reduction <add>, %105, %cst_50 [1] : vector<16x256xf32> to vector<16xf32>
    %109 = vector.shape_cast %108 : vector<16xf32> to vector<16x1xf32>
    %cst_51 = arith.constant 2.560000e+02 : f32
    %110 = vector.broadcast %cst_51 : f32 to vector<16x1xf32>
    %111 = arith.divf %109, %110 : vector<16x1xf32>
    %112 = vector.broadcast %111 : vector<16x1xf32> to vector<16x256xf32>
    %113 = arith.subf %105, %112 : vector<16x256xf32>
    %114 = arith.mulf %113, %113 : vector<16x256xf32>
    %cst_52 = arith.constant dense<0.000000e+00> : vector<16xf32>
    %115 = vector.multi_reduction <add>, %114, %cst_52 [1] : vector<16x256xf32> to vector<16xf32>
    %116 = vector.shape_cast %115 : vector<16xf32> to vector<16x1xf32>
    %cst_53 = arith.constant 2.560000e+02 : f32
    %117 = vector.broadcast %cst_53 : f32 to vector<16x1xf32>
    %118 = arith.divf %116, %117 : vector<16x1xf32>
    %119 = vector.broadcast %111 : vector<16x1xf32> to vector<16x256xf32>
    %120 = arith.subf %105, %119 : vector<16x256xf32>
    %cst_54 = arith.constant 9.99999974E-6 : f32
    %121 = vector.broadcast %cst_54 : f32 to vector<16x1xf32>
    %122 = arith.addf %118, %121 : vector<16x1xf32>
    %123 = math.rsqrt %122 : vector<16x1xf32>
    %124 = vector.broadcast %123 : vector<16x1xf32> to vector<16x256xf32>
    %125 = arith.mulf %120, %124 : vector<16x256xf32>
    %126 = vector.broadcast %106 : vector<1x256xf32> to vector<16x256xf32>
    %127 = arith.mulf %125, %126 : vector<16x256xf32>
    %128 = vector.broadcast %107 : vector<1x256xf32> to vector<16x256xf32>
    %129 = arith.addf %127, %128 : vector<16x256xf32>
    %c0_55 = arith.constant 0 : index
    %c0_56 = arith.constant 0 : index
    %c0_57 = arith.constant 0 : index
    %130 = vector.load %arg15[%c0_55, %c0_56, %c0_57] : memref<1x16x256xf32, #tpu.memory_space<vmem>>, vector<1x16x256xf32>
    %131 = vector.shape_cast %130 : vector<1x16x256xf32> to vector<16x256xf32>
    %132 = vector.shape_cast %129 : vector<16x256xf32> to vector<1x16x256xf32>
    tpu.vector_store %arg15[%c0_55, %c0_56, %c0_57], %132 {strides = array<i32>} : memref<1x16x256xf32, #tpu.memory_space<vmem>>, vector<1x16x256xf32>,
    return
  }
  func.func @transform_0(%arg0: i32) -> (i32, i32, i32) {
    %c0_i32 = arith.constant 0 : i32
    %c0_i32_0 = arith.constant 0 : i32
    %c0_i32_1 = arith.constant 0 : i32
    return %arg0, %c0_i32, %c0_i32_0 : i32, i32, i32
  }
  func.func @transform_1(%arg0: i32) -> (i32, i32, i32) {
    %c0_i32 = arith.constant 0 : i32
    %c0_i32_0 = arith.constant 0 : i32
    %c0_i32_1 = arith.constant 0 : i32
    return %arg0, %c0_i32, %c0_i32_0 : i32, i32, i32
  }
  func.func @transform_2(%arg0: i32) -> (i32, i32) {
    %c0_i32 = arith.constant 0 : i32
    %c0_i32_0 = arith.constant 0 : i32
    %c0_i32_1 = arith.constant 0 : i32
    return %c0_i32, %c0_i32_0 : i32, i32
  }
  func.func @transform_3(%arg0: i32) -> (i32, i32) {
    %c0_i32 = arith.constant 0 : i32
    %c0_i32_0 = arith.constant 0 : i32
    %c0_i32_1 = arith.constant 0 : i32
    return %c0_i32, %c0_i32_0 : i32, i32
  }
  func.func @transform_4(%arg0: i32) -> (i32, i32) {
    %c0_i32 = arith.constant 0 : i32
    %c0_i32_0 = arith.constant 0 : i32
    %c0_i32_1 = arith.constant 0 : i32
    return %c0_i32, %c0_i32_0 : i32, i32
  }
  func.func @transform_5(%arg0: i32) -> (i32, i32) {
    %c0_i32 = arith.constant 0 : i32
    %c0_i32_0 = arith.constant 0 : i32
    %c0_i32_1 = arith.constant 0 : i32
    return %c0_i32, %c0_i32_0 : i32, i32
  }
  func.func @transform_6(%arg0: i32) -> (i32, i32) {
    %c0_i32 = arith.constant 0 : i32
    %c0_i32_0 = arith.constant 0 : i32
    %c0_i32_1 = arith.constant 0 : i32
    return %c0_i32, %c0_i32_0 : i32, i32
  }
  func.func @transform_7(%arg0: i32) -> (i32, i32) {
    %c0_i32 = arith.constant 0 : i32
    %c0_i32_0 = arith.constant 0 : i32
    %c0_i32_1 = arith.constant 0 : i32
    return %c0_i32, %c0_i32_0 : i32, i32
  }
  func.func @transform_8(%arg0: i32) -> (i32, i32) {
    %c0_i32 = arith.constant 0 : i32
    %c0_i32_0 = arith.constant 0 : i32
    %c0_i32_1 = arith.constant 0 : i32
    return %c0_i32, %c0_i32_0 : i32, i32
  }
  func.func @transform_9(%arg0: i32) -> (i32, i32) {
    %c0_i32 = arith.constant 0 : i32
    %c0_i32_0 = arith.constant 0 : i32
    %c0_i32_1 = arith.constant 0 : i32
    return %c0_i32, %c0_i32_0 : i32, i32
  }
  func.func @transform_10(%arg0: i32) -> (i32, i32) {
    %c0_i32 = arith.constant 0 : i32
    %c0_i32_0 = arith.constant 0 : i32
    %c0_i32_1 = arith.constant 0 : i32
    return %c0_i32, %c0_i32_0 : i32, i32
  }
  func.func @transform_11(%arg0: i32) -> (i32, i32) {
    %c0_i32 = arith.constant 0 : i32
    %c0_i32_0 = arith.constant 0 : i32
    %c0_i32_1 = arith.constant 0 : i32
    return %c0_i32, %c0_i32_0 : i32, i32
  }
  func.func @transform_12(%arg0: i32) -> (i32, i32) {
    %c0_i32 = arith.constant 0 : i32
    %c0_i32_0 = arith.constant 0 : i32
    %c0_i32_1 = arith.constant 0 : i32
    return %c0_i32, %c0_i32_0 : i32, i32
  }
  func.func @transform_13(%arg0: i32) -> (i32, i32) {
    %c0_i32 = arith.constant 0 : i32
    %c0_i32_0 = arith.constant 0 : i32
    %c0_i32_1 = arith.constant 0 : i32
    return %c0_i32, %c0_i32_0 : i32, i32
  }
  func.func @transform_14(%arg0: i32) -> (i32, i32, i32) {
    %c0_i32 = arith.constant 0 : i32
    %c0_i32_0 = arith.constant 0 : i32
    %c0_i32_1 = arith.constant 0 : i32
    return %arg0, %c0_i32, %c0_i32_0 : i32, i32, i32
  }
}

</mosaic_0001>

<bundles_post_ra>
// kernel: tpu_custom_call.1
= control target key start
LH: loop header
LB: loop body
LE: loop exit
PB: predicated region body
PF: predicated region fallthrough
CT: control target
= control target key end

     0   :  { %s4829_s0 = inlined_call_operand.hbm [shape: f32[2,16,256], index: 0, kind: input, shape index: {}]   ;;  %s4830_s1 = inlined_call_operand.hbm [shape: bf16[2,16,16], index: 1, kind: input, shape index: {}]   ;;  %s4831_s2 = inlined_call_operand.hbm [shape: bf16[256,768], index: 2, kind: input, shape index: {}]   ;;  %s4832_s3 = inlined_call_operand.vmem [shape: f32[1,768], index: 3, kind: input, shape index: {}]   ;;  %s4833_s4 = inlined_call_operand.hbm [shape: bf16[256,256], index: 4, kind: input, shape index: {}]   ;;  %s4834_s5 = inlined_call_operand.vmem [shape: f32[1,256], index: 5, kind: input, shape index: {}]   ;;  %s4835_s6 = inlined_call_operand.hbm [shape: bf16[256,512], index: 6, kind: input, shape index: {}]   ;;  %s4836_s7 = inlined_call_operand.vmem [shape: f32[1,512], index: 7, kind: input, shape index: {}]   ;;  %s4837_s8 = inlined_call_operand.hbm [shape: bf16[512,256], index: 8, kind: input, shape index: {}]   ;;  %s4838_s9 = inlined_call_operand.vmem [shape: f32[1,256], index: 9, kind: input, shape index: {}]   ;;  %s4839_s10 = inlined_call_operand.vmem [shape: f32[1,256], index: 10, kind: input, shape index: {}]   ;;  %s4840_s11 = inlined_call_operand.vmem [shape: f32[1,256], index: 11, kind: input, shape index: {}]   ;;  %s4841_s12 = inlined_call_operand.vmem [shape: f32[1,256], index: 12, kind: input, shape index: {}]   ;;  %s4842_s13 = inlined_call_operand.vmem [shape: f32[1,256], index: 13, kind: input, shape index: {}]   ;;  %s4843_s14 = inlined_call_operand.hbm [shape: f32[2,16,256], index: 14, kind: output, shape index: {}]  }
   0x1   :  { %4854 = sst [smem:[#allocation22_spill]] %s4829_s0 }
   0x2   :  { %4855 = sst [smem:[#allocation23_spill]] %s4831_s2 }
   0x3   :  { %4856 = sst [smem:[#allocation24_spill]] %s4833_s4 }
   0x4   :  { %4857 = sst [smem:[#allocation25_spill]] %s4835_s6 }
   0x5   :  { %4858 = sst [smem:[#allocation26_spill]] %s4836_s7 }
   0x6   :  { %4859 = sst [smem:[#allocation27_spill]] %s4837_s8 }
   0x7   :  { %4860 = sst [smem:[#allocation28_spill]] %s4838_s9 }
   0x8   :  { %4861 = sst [smem:[#allocation29_spill]] %s4841_s12 }
   0x9   :  { %4862 = sst [smem:[#allocation30_spill]] %s4842_s13 }
   0xa   :  { %4863 = sst [smem:[#allocation31_spill]] %s4843_s14 }
   0xb   :  { %19 = vsyncpa [#allocation3], 0 }
   0xc   :  { %21 = vsyncpa [#allocation3 + $0x1], 0 }
   0xd   :  { %22 = vsyncpa [#allocation6], 0 }
   0xe   :  { %24 = vsyncpa [#allocation6 + $0x1], 0 }
   0xf   :  { %25 = vsyncpa [#allocation9], 0 }
  0x10   :  { %26 = vsyncpa [#allocation12], 0 }
  0x11   :  { %27 = vsyncpa [#allocation4], 0 }
  0x12   :  { %29 = vsyncpa [#allocation4 + $0x1], 0  ;;  %s4339_s29 = smov 0   ;;  %s4341_s30 = smov 0  }
  0x13   :  { %s4343_s15 = smov 0   ;;  %s4345_s16 = smov 0  }
  0x14 LB: > { %4864 = sst [smem:[#allocation20_spill]] %s4230_s29  ;;  %s4360_s17 = sadd.s32 4294967295, %s4242_s16   ;;  %s4242_s16 = sphi %s4345_s16, %s4905_s16   ;;  %s4238_s15 = sphi %s4343_s15, %s4904_s15   ;;  %s4234_s30 = sphi %s4341_s30, %s4903_s30   ;;  %s4230_s29 = sphi %s4339_s29, %s4902_s29  }
  0x15   : > { %s3136_s18 = sadd.s32 4294967294, %s4242_s16   ;;  %p55_p0 = scmp.ne.s32.totalorder %s4234_s30, %s4230_s29 }
  0x16   : > { %p4847_p1 = scmp.eq.s32.totalorder %s4360_s17, 0  ;;  %p363_p3 = scmp.eq.s32.totalorder %s3136_s18, 1 }
  0x17   : > { %p3137_p5 = scmp.ge.s32.totalorder %s4242_s16, 1  ;;  %p370_p7 = scmp.lt.s32.totalorder %s4242_s16, 3 }
  0x18   : > { %p4369_p4 = por %p4847_p1, %p55_p0  ;;  %p4374_p6 = por %p363_p3, %p55_p0 }
  0x19   : > { %p4379_p8 = pnand %p3137_p5, %p370_p7  ;;  %s4244_s22 = smov [#allocation7]  }
  0x1a   : > { %s4865_s19 = scalar_select %p4369_p4, 1, 0 }
  0x1b   : > { %s4866_s20 = scalar_select %p4374_p6, 1, 0 }
  0x1c   : > { %s4868_s21 = scalar_select %p4379_p8, 1, 0 }
  0x1d   : > { %4867 = sst [smem:[#allocation21_spill]] %s4866_s20  ;;  %s382_s23 = sshll.u32 %s4244_s22, 4  ;;  %s4383_s23 = int_to_ptr.vmem [resolvable:$true] %s382_s23 }
  0x1e   : > { %p3493_p9 = pneg %p4379_p8  ;;  %s4245_s25 = smov [#allocation8]  }
  0x1f   : > { %s398_s26 = sshll.u32 %s4245_s25, 4  ;;  %s4870_s2 = sld [smem:[#allocation23_spill]]  ;;  %s4394_s26 = int_to_ptr.vmem [resolvable:$true] %s398_s26 }
  0x20   : > { %p4390_p11 = pnand %p3493_p9, %p4847_p1 }
  0x22   : > { %p4404_p13 = pneg %p4390_p11 }
  0x25   : > { %s3988_s18 = scalar_lea.hbm %s4870_s2, 12288 }
  0x26   : > { %p3989_p12 = scmp.ne.s32.totalorder %s4870_s2, %s3988_s18  ;;  %p3995_p5 = scmp.lt.u32.totalorder %s3988_s18, %s4870_s2 }
  0x28   : > { %p3991_p0 = pnand %p4404_p13, %p3989_p12 }
  0x2a   : > { %p3992_p3 = pneg %p3991_p0 }
  0x2c   : > { %p3997_p7 = pnand %p3995_p5, %p3992_p3 }
  0x2e   : > { %4000 = shalt.err (!%p3997_p7)
}
  0x2f   : > { %s4001_s20 = scalar_lea.vmem %s4383_s23, 12288  ;;  %p4009_p2 = scmp.lt.s32.totalorder %s4383_s23, %s4383_s23 }
  0x30   : > { %p4002_p9 = scmp.ne.s32.totalorder %s4383_s23, %s4001_s20  ;;  %p4010_p6 = scmp.lt.s32.totalorder %s4001_s20, %s4001_s20 }
  0x32   : > { %p4004_p10 = pnand %p4002_p9, %p4404_p13  ;;  %p4011_p12 = por %p4010_p6, %p4009_p2 }
  0x34   : > { %p4005_p1 = pneg %p4004_p10 }
  0x36   : > { %p4012_p0 = pnand %p4011_p12, %p4005_p1 }
  0x38   : > { %4015 = shalt.err (!%p4012_p0)
}
  0x39   : > { %s4246_s27 = smov 384   ;;  %s4247_s14 = smov 24  }
  0x3a   : > { %3496 = dma.hbm_to_vmem [thread:$0]  (!%p4390_p11), %s4870_s2, 12288, %s4383_s23, [#allocation6], %s4246_s27, %s4246_s27, %s4247_s14  }
  0x3b   : > { %s4872_s4 = sld [smem:[#allocation24_spill]] }
  0x41   : > { %s4016_s13 = scalar_lea.hbm %s4872_s4, 4096 }
  0x42   : > { %p4017_p2 = scmp.ne.s32.totalorder %s4872_s4, %s4016_s13  ;;  %p4023_p10 = scmp.lt.u32.totalorder %s4016_s13, %s4872_s4 }
  0x44   : > { %p4019_p1 = pnand %p4017_p2, %p4404_p13 }
  0x46   : > { %p4020_p6 = pneg %p4019_p1 }
  0x48   : > { %p4025_p3 = pnand %p4023_p10, %p4020_p6 }
  0x4a   : > { %4028 = shalt.err (!%p4025_p3)
}
  0x4b   : > { %s4029_s23 = scalar_lea.vmem %s4394_s26, 4096  ;;  %p4037_p12 = scmp.lt.s32.totalorder %s4394_s26, %s4394_s26 }
  0x4c   : > { %p4030_p5 = scmp.ne.s32.totalorder %s4394_s26, %s4029_s23  ;;  %p4038_p0 = scmp.lt.s32.totalorder %s4029_s23, %s4029_s23 }
  0x4e   : > { %p4032_p7 = pnand %p4030_p5, %p4404_p13  ;;  %p4039_p2 = por %p4038_p0, %p4037_p12 }
  0x50   : > { %p4033_p9 = pneg %p4032_p7 }
  0x52   : > { %p4040_p1 = pnand %p4039_p2, %p4033_p9 }
  0x54   : > { %4043 = shalt.err (!%p4040_p1)
}
  0x55   : > { %s4850_s9 = smov 128   ;;  %s4851_s7 = smov 8  }
  0x56   : > { %3499 = dma.hbm_to_vmem [thread:$0]  (!%p4390_p11), %s4872_s4, 4096, %s4394_s26, [#allocation9], %s4850_s9, %s4850_s9, %s4851_s7  }
  0x57   : > { %s4250_s27 = smov [#allocation10]   ;;  %s4873_s6 = sld [smem:[#allocation25_spill]] }
  0x58   : > { %s414_s14 = sshll.u32 %s4250_s27, 4  ;;  %s415_s14 = int_to_ptr.vmem [resolvable:$true] %s414_s14 }
  0x5d   : > { %s4044_s22 = scalar_lea.hbm %s4873_s6, 8192 }
  0x5e   : > { %p4045_p6 = scmp.ne.s32.totalorder %s4873_s6, %s4044_s22  ;;  %p4051_p5 = scmp.lt.u32.totalorder %s4044_s22, %s4873_s6 }
  0x60   : > { %p4047_p10 = pnand %p4045_p6, %p4404_p13 }
  0x62   : > { %p4048_p3 = pneg %p4047_p10 }
  0x64   : > { %p4053_p7 = pnand %p4051_p5, %p4048_p3 }
  0x66   : > { %4056 = shalt.err (!%p4053_p7)
}
  0x67   : > { %s4057_s26 = scalar_lea.vmem %s415_s14, 8192  ;;  %p4065_p2 = scmp.lt.s32.totalorder %s415_s14, %s415_s14 }
  0x68   : > { %p4058_p9 = scmp.ne.s32.totalorder %s415_s14, %s4057_s26  ;;  %p4066_p1 = scmp.lt.s32.totalorder %s4057_s26, %s4057_s26 }
  0x6a   : > { %p4060_p12 = pnand %p4058_p9, %p4404_p13  ;;  %p4067_p4 = por %p4066_p1, %p4065_p2 }
  0x6c   : > { %p4061_p0 = pneg %p4060_p12 }
  0x6e   : > { %p4068_p8 = pnand %p4067_p4, %p4061_p0 }
  0x70   : > { %4071 = shalt.err (!%p4068_p8)
}
  0x71   : > { %s4852_s12 = smov 256   ;;  %s4853_s13 = smov 16  }
  0x72   : > { %3502 = dma.hbm_to_vmem [thread:$0]  (!%p4390_p11), %s4873_s6, 8192, %s415_s14, [#allocation9], %s4852_s12, %s4852_s12, %s4853_s13  }
  0x73   : > { %s4253_s28 = smov [#allocation11]   ;;  %s4874_s8 = sld [smem:[#allocation27_spill]] }
  0x74   : > { %s430_s18 = sshll.u32 %s4253_s28, 4  ;;  %s431_s18 = int_to_ptr.vmem [resolvable:$true] %s430_s18 }
  0x79   : > { %s4072_s20 = scalar_lea.hbm %s4874_s8, 8192 }
  0x7a   : > { %p4073_p4 = scmp.ne.s32.totalorder %s4874_s8, %s4072_s20  ;;  %p4079_p10 = scmp.lt.u32.totalorder %s4072_s20, %s4874_s8 }
  0x7c   : > { %p4075_p8 = pnand %p4073_p4, %p4404_p13 }
  0x7e   : > { %p4076_p6 = pneg %p4075_p8 }
  0x80   : > { %p4081_p3 = pnand %p4079_p10, %p4076_p6 }
  0x82   : > { %4084 = shalt.err (!%p4081_p3)
}
  0x83   : > { %s4085_s14 = scalar_lea.vmem %s431_s18, 8192  ;;  %p4093_p12 = scmp.lt.s32.totalorder %s431_s18, %s431_s18 }
  0x84   : > { %p4086_p5 = scmp.ne.s32.totalorder %s431_s18, %s4085_s14  ;;  %p4094_p0 = scmp.lt.s32.totalorder %s4085_s14, %s4085_s14 }
  0x86   : > { %p4088_p7 = pnand %p4086_p5, %p4404_p13  ;;  %p4095_p2 = por %p4094_p0, %p4093_p12 }
  0x88   : > { %p4089_p9 = pneg %p4088_p7 }
  0x8a   : > { %p4096_p1 = pnand %p4095_p2, %p4089_p9 }
  0x8c   : > { %4099 = shalt.err (!%p4096_p1)
}
  0x8d   : > { %s4875_s2 = smov 8   ;;  %s4876_s27 = smov 128  }
  0x8e   : > { %3505 = dma.hbm_to_vmem [thread:$0]  (!%p4390_p11), %s4874_s8, 8192, %s431_s18, [#allocation12], %s4876_s27, %s4876_s27, %s4875_s2  }
  0x8f   : > { %s4494_s29 = sadd.s32 1, %s4242_s16   ;;  %s42_s24 = sadd.s32 1, %s4238_s15 }
  0x90   : > { %s39_s28 = ssub.s32 %s4242_s16, %s4494_s29  ;;  %p49_p13 = scmp.ne.s32.totalorder %s4238_s15, %s4234_s30 }
  0x91   : > { %p40_p4 = scmp.eq.s32.totalorder %s39_s28, 0  ;;  %p50_p8 = scmp.eq.s32.totalorder %s4242_s16, 0 }
  0x92   : > { %p4877_p6 = scmp.eq.s32.totalorder %s4360_s17, 1  ;;  %p3521_p3 = scmp.lt.s32.totalorder %s4242_s16, 2 }
  0x93   : > { %s4510_s25 = scalar_select %p40_p4, %s4238_s15, %s42_s24  }
  0x94   : > { %p4504_p10 = por %p4877_p6, %p49_p13  ;;  %p51_p5 = por %p50_p8, %p49_p13 }
  0x95   : > { %s4513_s20 = sand.u32 1, %s4238_s15   ;;  %s3420_s23 = sshll.u32 %s4242_s16, 9 }
  0x96   : > { %s3143_s18 = sshll.u32 %s4513_s20, 5  ;;  %s4879_s0 = sld [smem:[#allocation22_spill]] }
  0x97   : > { %s463_s27 = scalar_lea.vmem [#allocation2], %s3143_s18  ;;  %p4524_p11 = pnand %p3521_p3, %p51_p5 }
  0x98   : > { %s470_s9 = sshll.u32 %s463_s27, 4  ;;  %s3146_s28 = sshll.u32 %s4513_s20, 3  ;;  %s4522_s9 = int_to_ptr.vmem [resolvable:$true] %s470_s9 }
  0x99   : > { %s460_s12 = scalar_lea.sflag [#allocation3], %s4513_s20  ;;  %p4102_p9 = pneg %p4524_p11 }
  0x9c   : > { %s4520_s2 = scalar_lea.hbm %s4879_s0, %s3420_s23  ;;  %s4105_s14 = scalar_lea.hbm %s4879_s0, 1024 }
  0x9d   : > { %s4100_s26 = scalar_lea.hbm %s4520_s2, 512  ;;  %p4106_p2 = scmp.lt.u32.totalorder %s4520_s2, %s4879_s0 }
  0x9e   : > { %p4101_p7 = scmp.ne.s32.totalorder %s4520_s2, %s4100_s26  ;;  %p4107_p1 = scmp.lt.u32.totalorder %s4105_s14, %s4100_s26 }
  0x9f   : > { %p4109_p4 = scmp.lt.u32.totalorder %s4100_s26, %s4520_s2 }
  0xa0   : > { %p4103_p12 = pnand %p4102_p9, %p4101_p7  ;;  %p4108_p13 = por %p4107_p1, %p4106_p2 }
  0xa2   : > { %p4104_p0 = pneg %p4103_p12  ;;  %p4110_p8 = por %p4109_p4, %p4108_p13 }
  0xa4   : > { %p4111_p6 = pnand %p4110_p8, %p4104_p0 }
  0xa6   : > { %4114 = shalt.err (!%p4111_p6)
}
  0xa7   : > { %s4115_s24 = scalar_lea.vmem %s4522_s9, 512  ;;  %s4254_s18 = smov [#allocation2]  }
  0xa8   : > { %p4116_p3 = scmp.ne.s32.totalorder %s4522_s9, %s4115_s24  ;;  %s4120_s23 = sshll.u32 %s4254_s18, 4  ;;  %s4121_s23 = int_to_ptr.vmem [resolvable:$false] %s4120_s23 }
  0xa9   : > { %s4122_s13 = scalar_lea.vmem %s4121_s23, 1024  ;;  %p4123_p12 = scmp.lt.s32.totalorder %s4522_s9, %s4121_s23 }
  0xaa   : > { %p4118_p5 = pnand %p4116_p3, %p4102_p9  ;;  %p4124_p2 = scmp.lt.s32.totalorder %s4122_s13, %s4115_s24 }
  0xac   : > { %p4119_p7 = pneg %p4118_p5  ;;  %p4125_p1 = por %p4124_p2, %p4123_p12 }
  0xae   : > { %p4126_p13 = pnand %p4125_p1, %p4119_p7 }
  0xb0   : > { %4129 = shalt.err (!%p4126_p13)
}
  0xb1   : > { %s4881_s26 = smov 16   ;;  %s4882_s14 = smov 256  }
  0xb2   : > { %3509 = dma.hbm_to_vmem [thread:$0]  (!%p4524_p11), %s4520_s2, 512, %s4522_s9, %s460_s12, %s4882_s14, %s4882_s14, %s4881_s26  }
  0xb3   : > { %s3421_s27 = sshll.u32 %s4242_s16, 7  ;;  %s484_s13 = scalar_lea.vmem [#allocation5], %s3146_s28 }
  0xb4   : > { %s4565_s23 = scalar_lea.hbm %s4830_s1, %s3421_s27  ;;  %s491_s0 = sshll.u32 %s484_s13, 4  ;;  %s4569_s0 = int_to_ptr.vmem [resolvable:$true] %s491_s0 }
  0xb5   : > { %s4883_s4 = sand.u32 1, %s4242_s16   ;;  %s4130_s8 = scalar_lea.hbm %s4565_s23, 128 }
  0xb6   : > { %s4573_s6 = scalar_lea.sflag [#allocation6], %s4883_s4  ;;  %p4131_p0 = scmp.ne.s32.totalorder %s4565_s23, %s4130_s8 }
  0xb7   : > { %s4135_s20 = scalar_lea.hbm %s4830_s1, 256  ;;  %p4136_p6 = scmp.lt.u32.totalorder %s4565_s23, %s4830_s1 }
  0xb8   : > { %p4133_p4 = pnand %p4131_p0, %p4102_p9  ;;  %p4137_p3 = scmp.lt.u32.totalorder %s4135_s20, %s4130_s8 }
  0xb9   : > { %p4139_p7 = scmp.lt.u32.totalorder %s4130_s8, %s4565_s23 }
  0xba   : > { %p4134_p8 = pneg %p4133_p4  ;;  %p4138_p5 = por %p4137_p3, %p4136_p6 }
  0xbc   : > { %p4140_p12 = por %p4139_p7, %p4138_p5 }
  0xbe   : > { %p4141_p2 = pnand %p4140_p12, %p4134_p8 }
  0xc0   : > { %4144 = shalt.err (!%p4141_p2)
}
  0xc1   : > { %s4145_s4 = scalar_lea.vmem %s4569_s0, 128  ;;  %s4255_s28 = smov [#allocation5]  }
  0xc2   : > { %p4146_p1 = scmp.ne.s32.totalorder %s4569_s0, %s4145_s4  ;;  %s4150_s14 = sshll.u32 %s4255_s28, 4  ;;  %s4151_s14 = int_to_ptr.vmem [resolvable:$false] %s4150_s14 }
  0xc3   : > { %s4152_s27 = scalar_lea.vmem %s4151_s14, 256  ;;  %p4153_p4 = scmp.lt.s32.totalorder %s4569_s0, %s4151_s14 }
  0xc4   : > { %p4148_p13 = pnand %p4146_p1, %p4102_p9  ;;  %p4154_p6 = scmp.lt.s32.totalorder %s4152_s27, %s4145_s4 }
  0xc6   : > { %p4149_p0 = pneg %p4148_p13  ;;  %p4155_p3 = por %p4154_p6, %p4153_p4 }
  0xc8   : > { %p4156_p5 = pnand %p4155_p3, %p4149_p0 }
  0xca   : > { %4159 = shalt.err (!%p4156_p5)
}
  0xcb   : > { %s4256_s8 = smov 64   ;;  %s4257_s18 = smov 4  }
  0xcc   : > { %3512 = dma.hbm_to_vmem [thread:$0]  (!%p4524_p11), %s4565_s23, 128, %s4569_s0, %s4573_s6, %s4256_s8, %s4256_s8, %s4257_s18  }
  0xcd   : > { %p4884_p9 = scmp.ne.s32.totalorder %s4868_s21, 0 }
  0xce   : > { %s4602_s24 = sand.u32 (!%p4884_p9), 1, %s4234_s30   ;;  %p4885_p8 = scmp.ne.s32.totalorder (!%p4884_p9), %s4865_s19, 0 }
  0xcf   : > { %503 = sbr.rel (%p4884_p9) target bundleno = 2739 (0xab3), region = 76  ;;  %s3150_s13 = sshll.u32 (!%p4884_p9), %s4602_s24, 5 }
  0xd0   : > { %s506_s12 = scalar_lea.sflag (!%p4884_p9), [#allocation3], %s4602_s24  ;;  %s4608_s2 = scalar_lea.vmem (!%p4884_p9), [#allocation2], %s3150_s13 }
  0xd6   : > { %4205 = dma.done.wait (%p4885_p8), %s506_s12, 512  }
  0xd7   : > { %4207 = vsyncadd (%p4885_p8), %s506_s12, 4294966784  ;;  %s514_s0 = sand.u32 1, %s4360_s17   ;;  %s3151_s6 = sshll.u32 %s4602_s24, 3 }
  0xd8   : > { %s515_s21 = scalar_lea.sflag [#allocation6], %s514_s0  ;;  %s4616_s7 = scalar_lea.vmem [#allocation5], %s3151_s6 }
  0xd9   : > { %4209 = dma.done.wait (%p4885_p8), %s515_s21, 128  }
  0xda   : > { %4211 = vsyncadd (%p4885_p8), %s515_s21, 4294967168  ;;  %p4886_p11 = scmp.eq.s32.totalorder %s4360_s17, 0 }
  0xdc   : > { %4213 = dma.done.wait (%p4886_p11), [#allocation6], 12288   ;;  %p4887_p7 = pmov %p4886_p11 }
  0xde   : > { %4215 = vsyncadd (%p4887_p7), [#allocation6], 4294955008  ;;  %p4888_p12 = pmov %p4887_p7 }
  0xdf   : > { %p4889_p2 = pmov %p4887_p7 }
  0xe0   : > { %4217 = dma.done.wait (%p4888_p12), [#allocation9], 12288  }
  0xe1   : > { %4219 = vsyncadd (%p4889_p2), [#allocation9], 4294955008  ;;  %p4890_p1 = pmov %p4889_p2 }
  0xe3   : > { %4221 = dma.done.wait (%p4890_p1), [#allocation12], 8192   ;;  %p4891_p13 = pmov %p4890_p1 }
  0xe4   : > { %v3576_v0 = vld [vmem:[#allocation7 + $0x4] ss:$24 sps:$4 sm:$0xff]   ;;  %v3578_v1 = vld [vmem:[#allocation7] ss:$24 sps:$4 sm:$0xff]   ;;  %v3579_v2 = vld [vmem:[#allocation7 + $0x34] ss:$24 sps:$4 sm:$0xff]  }
  0xe5   : > { %4223 = vsyncadd (%p4891_p13), [#allocation12], 4294959104  ;;  %1203 = vmatprep.subr.bf16.mxu1 %v3576_v0  ;;  %v3581_v3 = vld [vmem:[#allocation7 + $0x30] ss:$24 sps:$4 sm:$0xff]   ;;  %v3582_v4 = vld [vmem:[#allocation7 + $0x64] ss:$24 sps:$4 sm:$0xff]  }
  0xe6   : > { %1204 = vmatpush1.bf16.msra.mxu1 %v3578_v1  ;;  %v3584_v5 = vld [vmem:[#allocation7 + $0x60] ss:$24 sps:$4 sm:$0xff]   ;;  %v3585_v6 = vld [vmem:[#allocation7 + $0x94] ss:$24 sps:$4 sm:$0xff]   ;;  %v3587_v7 = vld [vmem:[#allocation7 + $0x90] ss:$24 sps:$4 sm:$0xff]  }
  0xe7   : > { %1205 = vmatprep.subr.bf16.mxu1 %v3579_v2  ;;  %v3588_v8 = vld [vmem:[#allocation7 + $0xc4] ss:$24 sps:$4 sm:$0xff]   ;;  %v3590_v9 = vld [vmem:[#allocation7 + $0xc0] ss:$24 sps:$4 sm:$0xff]   ;;  %v3591_v10 = vld [vmem:[#allocation7 + $0xf4] ss:$24 sps:$4 sm:$0xff]  }
  0xe8   : > { %v3593_v11 = vld [vmem:[#allocation7 + $0xf0] ss:$24 sps:$4 sm:$0xff]   ;;  %v3594_v12 = vld [vmem:[#allocation7 + $0x124] ss:$24 sps:$4 sm:$0xff]   ;;  %v3596_v16 = vld [vmem:[#allocation7 + $0x120] ss:$24 sps:$4 sm:$0xff]  }
  0xe9   : > { %v586_v13 = vld [vmem:[%s4608_s2 + $0x8] sm:$0xff]  ;;  %v588_v14 = vld [vmem:[%s4608_s2 + $0x18] sm:$0xff]  ;;  %v585_v35 = vld [vmem:[%s4608_s2] sm:$0xff]  ;;  %vm4259_vm0 = vmmov 0   ;;  %vm1415_vm1 = vcmask 130048   ;;  %s4892_s18 = sld [smem:[#allocation26_spill]] }
  0xea   : > { %1206 = vmatpush1.bf16.msra.mxu1 %v3581_v3  ;;  %v590_v15 = vpack.c.bf16 %v588_v14, %v586_v13  ;;  %v3597_v17 = vld [vmem:[#allocation7 + $0x154] ss:$24 sps:$4 sm:$0xff]   ;;  %v3599_v18 = vld [vmem:[#allocation7 + $0x150] ss:$24 sps:$4 sm:$0xff]   ;;  %v3600_v19 = vld [vmem:[#allocation7 + $0x184] ss:$24 sps:$4 sm:$0xff]  }
  0xeb   : > { %1207 = vmatprep.subr.bf16.mxu1 %v3582_v4  ;;  %v3602_v20 = vld [vmem:[#allocation7 + $0x180] ss:$24 sps:$4 sm:$0xff]   ;;  %v3603_v21 = vld [vmem:[#allocation7 + $0x1b4] ss:$24 sps:$4 sm:$0xff]   ;;  %v3605_v22 = vld [vmem:[#allocation7 + $0x1b0] ss:$24 sps:$4 sm:$0xff]  }
  0xec   : > { %1235 = vmatprep.mubr.bf16.mxu1 %v590_v15  ;;  %1321 = vmatprep.mubr.bf16.mxu0 %v590_v15  ;;  %v3606_v23 = vld [vmem:[#allocation7 + $0x1e4] ss:$24 sps:$4 sm:$0xff]   ;;  %v3608_v24 = vld [vmem:[#allocation7 + $0x1e0] ss:$24 sps:$4 sm:$0xff]   ;;  %v3609_v25 = vld [vmem:[#allocation7 + $0x214] ss:$24 sps:$4 sm:$0xff]  }
  0xed   : > { %v3611_v26 = vld [vmem:[#allocation7 + $0x210] ss:$24 sps:$4 sm:$0xff]   ;;  %v3612_v27 = vld [vmem:[#allocation7 + $0x244] ss:$24 sps:$4 sm:$0xff]   ;;  %v3614_v28 = vld [vmem:[#allocation7 + $0x240] ss:$24 sps:$4 sm:$0xff]  }
  0xee   : > { %1208 = vmatpush1.bf16.msra.mxu1 %v3584_v5  ;;  %v3615_v29 = vld [vmem:[#allocation7 + $0x274] ss:$24 sps:$4 sm:$0xff]   ;;  %v3617_v30 = vld [vmem:[#allocation7 + $0x270] ss:$24 sps:$4 sm:$0xff]   ;;  %v3618_v31 = vld [vmem:[#allocation7 + $0x2a4] ss:$24 sps:$4 sm:$0xff]  }
  0xef   : > { %1209 = vmatprep.subr.bf16.mxu1 %v3585_v6  ;;  %v3620_v32 = vld [vmem:[#allocation7 + $0x2a0] ss:$24 sps:$4 sm:$0xff]   ;;  %v3621_v33 = vld [vmem:[#allocation7 + $0x2d4] ss:$24 sps:$4 sm:$0xff]   ;;  %v3623_v34 = vld [vmem:[#allocation7 + $0x2d0] ss:$24 sps:$4 sm:$0xff]  }
  0xf0   : > { %v587_v36 = vld [vmem:[%s4608_s2 + $0x10] sm:$0xff]  ;;  %v3629_v40 = vld [vmem:[#allocation7 + $0x3c] ss:$24 sps:$4 sm:$0xff]   ;;  %v3627_v41 = vld [vmem:[#allocation7 + $0x38] ss:$24 sps:$4 sm:$0xff]   ;;  %s4893_s0 = sld [smem:[#allocation28_spill]] }
  0xf1   : > { %v3626_v37 = vld [vmem:[#allocation7 + $0xc] ss:$24 sps:$4 sm:$0xff]   ;;  %v3624_v38 = vld [vmem:[#allocation7 + $0x8] ss:$24 sps:$4 sm:$0xff]   ;;  %v4638_v39 = vpack.c.bf16 %v587_v36, %v585_v35  ;;  %v3635_v44 = vld [vmem:[#allocation7 + $0x9c] ss:$24 sps:$4 sm:$0xff]  }
  0xf2   : > { %1210 = vmatpush1.bf16.msra.mxu1 %v3587_v7  ;;  %v3632_v42 = vld [vmem:[#allocation7 + $0x6c] ss:$24 sps:$4 sm:$0xff]   ;;  %v3630_v43 = vld [vmem:[#allocation7 + $0x68] ss:$24 sps:$4 sm:$0xff]   ;;  %v3633_v45 = vld [vmem:[#allocation7 + $0x98] ss:$24 sps:$4 sm:$0xff]  }
  0xf3   : > { %1211 = vmatprep.subr.bf16.mxu1 %v3588_v8  ;;  %v3638_v46 = vld [vmem:[#allocation7 + $0xcc] ss:$24 sps:$4 sm:$0xff]   ;;  %v3636_v47 = vld [vmem:[#allocation7 + $0xc8] ss:$24 sps:$4 sm:$0xff]   ;;  %v3641_v48 = vld [vmem:[#allocation7 + $0xfc] ss:$24 sps:$4 sm:$0xff]  }
  0xf4   : > { %v3639_v49 = vld [vmem:[#allocation7 + $0xf8] ss:$24 sps:$4 sm:$0xff]   ;;  %v3644_v50 = vld [vmem:[#allocation7 + $0x12c] ss:$24 sps:$4 sm:$0xff]   ;;  %v3642_v51 = vld [vmem:[#allocation7 + $0x128] ss:$24 sps:$4 sm:$0xff]  }
  0xf5   : > { %v3647_v52 = vld [vmem:[#allocation7 + $0x15c] ss:$24 sps:$4 sm:$0xff]   ;;  %v3645_v53 = vld [vmem:[#allocation7 + $0x158] ss:$24 sps:$4 sm:$0xff]   ;;  %v3650_v54 = vld [vmem:[#allocation7 + $0x18c] ss:$24 sps:$4 sm:$0xff]  }
  0xf6   : > { %1212 = vmatpush1.bf16.msra.mxu1 %v3590_v9  ;;  %v3648_v55 = vld [vmem:[#allocation7 + $0x188] ss:$24 sps:$4 sm:$0xff]   ;;  %v3653_v56 = vld [vmem:[#allocation7 + $0x1bc] ss:$24 sps:$4 sm:$0xff]   ;;  %v3651_v57 = vld [vmem:[#allocation7 + $0x1b8] ss:$24 sps:$4 sm:$0xff]  }
  0xf7   : > { %1213 = vmatprep.subr.bf16.mxu1 %v3591_v10  ;;  %v3656_v58 = vld [vmem:[#allocation7 + $0x1ec] ss:$24 sps:$4 sm:$0xff]   ;;  %v3654_v59 = vld [vmem:[#allocation7 + $0x1e8] ss:$24 sps:$4 sm:$0xff]   ;;  %v3659_v60 = vld [vmem:[#allocation7 + $0x21c] ss:$24 sps:$4 sm:$0xff]  }
  0xf8   : > { %v3657_v61 = vld [vmem:[#allocation7 + $0x218] ss:$24 sps:$4 sm:$0xff]   ;;  %v3662_v62 = vld [vmem:[#allocation7 + $0x24c] ss:$24 sps:$4 sm:$0xff]   ;;  %v3660_v63 = vld [vmem:[#allocation7 + $0x248] ss:$24 sps:$4 sm:$0xff]  }
  0xf9   : > { %v3665_v0 = vld [vmem:[#allocation7 + $0x27c] ss:$24 sps:$4 sm:$0xff]   ;;  %v3663_v1 = vld [vmem:[#allocation7 + $0x278] ss:$24 sps:$4 sm:$0xff]   ;;  %v3668_v2 = vld [vmem:[#allocation7 + $0x2ac] ss:$24 sps:$4 sm:$0xff]  }
  0xfa   : > { %1214 = vmatpush1.bf16.msra.mxu1 %v3593_v11  ;;  %v3666_v3 = vld [vmem:[#allocation7 + $0x2a8] ss:$24 sps:$4 sm:$0xff]   ;;  %v3671_v4 = vld [vmem:[#allocation7 + $0x2dc] ss:$24 sps:$4 sm:$0xff]   ;;  %v3669_v5 = vld [vmem:[#allocation7 + $0x2d8] ss:$24 sps:$4 sm:$0xff]  }
  0xfb   : > { %1215 = vmatprep.subr.bf16.mxu1 %v3594_v12  ;;  %v3672_v6 = vld [vmem:[#allocation7 + $0x14] ss:$24 sps:$4 sm:$0xff]   ;;  %v3674_v7 = vld [vmem:[#allocation7 + $0x10] ss:$24 sps:$4 sm:$0xff]   ;;  %v3675_v8 = vld [vmem:[#allocation7 + $0x44] ss:$24 sps:$4 sm:$0xff]  }
  0xfc   : > { %1289 = vmatprep.subr.bf16.mxu0 %v3672_v6  ;;  %v3677_v9 = vld [vmem:[#allocation7 + $0x40] ss:$24 sps:$4 sm:$0xff]   ;;  %v3678_v10 = vld [vmem:[#allocation7 + $0x74] ss:$24 sps:$4 sm:$0xff]   ;;  %v3680_v11 = vld [vmem:[#allocation7 + $0x70] ss:$24 sps:$4 sm:$0xff]  }
  0xfd   : > { %1290 = vmatpush1.bf16.msra.mxu0 %v3674_v7  ;;  %v3681_v12 = vld [vmem:[#allocation7 + $0xa4] ss:$24 sps:$4 sm:$0xff]   ;;  %v3683_v13 = vld [vmem:[#allocation7 + $0xa0] ss:$24 sps:$4 sm:$0xff]   ;;  %v3684_v14 = vld [vmem:[#allocation7 + $0xd4] ss:$24 sps:$4 sm:$0xff]  }
  0xfe   : > { %1216 = vmatpush1.bf16.msra.mxu1 %v3596_v16  ;;  %1291 = vmatprep.subr.bf16.mxu0 %v3675_v8  ;;  %v3687_v16 = vld [vmem:[#allocation7 + $0x104] ss:$24 sps:$4 sm:$0xff]   ;;  %v3716_v35 = vld [vmem:[#allocation7 + $0x2b0] ss:$24 sps:$4 sm:$0xff]   ;;  %s4895_s20 = sld [smem:[#allocation30_spill]]  ;;  %s3422_s9 = sshll.u32 %s4360_s17, 9 }
  0xff   : > { %1217 = vmatprep.subr.bf16.mxu1 %v3597_v17  ;;  %v3689_v17 = vld [vmem:[#allocation7 + $0x100] ss:$24 sps:$4 sm:$0xff]   ;;  %v3717_v36 = vld [vmem:[#allocation7 + $0x2e4] ss:$24 sps:$4 sm:$0xff]   ;;  %s583_s26 = scalar_lea.vmem [#allocation13], %s3150_s13  ;;  %s4896_s27 = sld [smem:[#allocation31_spill]] }
 0x100   : > { %s3002_s4 = sshll.u32 %s583_s26, 4  ;;  %s2989_s17 = scalar_lea.sflag [#allocation4], %s4602_s24  ;;  %s4785_s4 = int_to_ptr.vmem [resolvable:$true] %s3002_s4 }
 0x101   : > { %1292 = vmatpush1.bf16.msra.mxu0 %v3677_v9  ;;  %s4160_s13 = scalar_lea.vmem %s4785_s4, 512 }
 0x102   : > { %1218 = vmatpush1.bf16.msra.mxu1 %v3599_v18  ;;  %1293 = vmatprep.subr.bf16.mxu0 %v3678_v10  ;;  %v3690_v18 = vld [vmem:[#allocation7 + $0x134] ss:$24 sps:$4 sm:$0xff]   ;;  %p4161_p0 = scmp.ne.s32.totalorder %s4785_s4, %s4160_s13 }
 0x103   : > { %1219 = vmatprep.subr.bf16.mxu1 %v3600_v19  ;;  %v3692_v19 = vld [vmem:[#allocation7 + $0x130] ss:$24 sps:$4 sm:$0xff]  }
 0x104   : > { %p4162_p4 = pnand %p4161_p0, %p4504_p10 }
 0x105   : > { %1294 = vmatpush1.bf16.msra.mxu0 %v3680_v11  ;;  %s4783_s8 = scalar_lea.hbm %s4896_s27, %s3422_s9 }
 0x106   : > { %1220 = vmatpush1.bf16.msra.mxu1 %v3602_v20  ;;  %1295 = vmatprep.subr.bf16.mxu0 %v3681_v12  ;;  %v3693_v20 = vld [vmem:[#allocation7 + $0x164] ss:$24 sps:$4 sm:$0xff]   ;;  %p4163_p6 = pneg %p4162_p4 }
 0x107   : > { %1221 = vmatprep.subr.bf16.mxu1 %v3603_v21  ;;  %v3695_v21 = vld [vmem:[#allocation7 + $0x160] ss:$24 sps:$4 sm:$0xff]  }
 0x109   : > { %1296 = vmatpush1.bf16.msra.mxu0 %v3683_v13 }
 0x10a   : > { %1222 = vmatpush1.bf16.msra.mxu1 %v3605_v22  ;;  %1297 = vmatprep.subr.bf16.mxu0 %v3684_v14  ;;  %v3696_v22 = vld [vmem:[#allocation7 + $0x194] ss:$24 sps:$4 sm:$0xff]  }
 0x10b   : > { %1223 = vmatprep.subr.bf16.mxu1 %v3606_v23  ;;  %v3698_v23 = vld [vmem:[#allocation7 + $0x190] ss:$24 sps:$4 sm:$0xff]  }
 0x10e   : > { %1224 = vmatpush1.bf16.msra.mxu1 %v3608_v24  ;;  %v3699_v24 = vld [vmem:[#allocation7 + $0x1c4] ss:$24 sps:$4 sm:$0xff]  }
 0x10f   : > { %1225 = vmatprep.subr.bf16.mxu1 %v3609_v25  ;;  %v3701_v25 = vld [vmem:[#allocation7 + $0x1c0] ss:$24 sps:$4 sm:$0xff]  }
 0x112   : > { %1226 = vmatpush1.bf16.msra.mxu1 %v3611_v26  ;;  %v3702_v26 = vld [vmem:[#allocation7 + $0x1f4] ss:$24 sps:$4 sm:$0xff]  }
 0x113   : > { %1227 = vmatprep.subr.bf16.mxu1 %v3612_v27  ;;  %v3704_v27 = vld [vmem:[#allocation7 + $0x1f0] ss:$24 sps:$4 sm:$0xff]  }
 0x116   : > { %1228 = vmatpush1.bf16.msra.mxu1 %v3614_v28  ;;  %v3705_v28 = vld [vmem:[#allocation7 + $0x224] ss:$24 sps:$4 sm:$0xff]  }
 0x117   : > { %1229 = vmatprep.subr.bf16.mxu1 %v3615_v29  ;;  %v3707_v29 = vld [vmem:[#allocation7 + $0x220] ss:$24 sps:$4 sm:$0xff]  }
 0x11a   : > { %1230 = vmatpush1.bf16.msra.mxu1 %v3617_v30  ;;  %v3708_v30 = vld [vmem:[#allocation7 + $0x254] ss:$24 sps:$4 sm:$0xff]  }
 0x11b   : > { %1231 = vmatprep.subr.bf16.mxu1 %v3618_v31  ;;  %v3710_v31 = vld [vmem:[#allocation7 + $0x250] ss:$24 sps:$4 sm:$0xff]  }
 0x11e   : > { %1232 = vmatpush1.bf16.msra.mxu1 %v3620_v32  ;;  %v3711_v32 = vld [vmem:[#allocation7 + $0x284] ss:$24 sps:$4 sm:$0xff]  }
 0x11f   : > { %1233 = vmatprep.subr.bf16.mxu1 %v3621_v33  ;;  %v3713_v33 = vld [vmem:[#allocation7 + $0x280] ss:$24 sps:$4 sm:$0xff]  }
 0x122   : > { %1234 = vmatpush1.bf16.msra.mxu1 %v3623_v34  ;;  %v3714_v34 = vld [vmem:[#allocation7 + $0x2b4] ss:$24 sps:$4 sm:$0xff]  }
 0x123   : > { %1246 = vmatprep.subr.bf16.mxu1 %v3626_v37  ;;  %v3719_v37 = vld [vmem:[#allocation7 + $0x2e0] ss:$24 sps:$4 sm:$0xff]  }
 0x125   : > { %1236 = vmatmul.mubr.bf16.vlgmr.msra.gmra.mrb[0].mxu1 %v4638_v39 }
 0x126   : > { %1247 = vmatpush1.bf16.msra.mxu1 %v3624_v38  ;;  %1278 = vmatprep.mubr.bf16.mxu1 %v590_v15  ;;  %v3686_v15 = vld [vmem:[#allocation7 + $0xd0] ss:$24 sps:$4 sm:$0xff]   ;;  %v4258_v38 = vmov 0.0  }
 0x127   : > { %1248 = vmatprep.subr.bf16.mxu1 %v3629_v40  ;;  %1298 = vmatpush1.bf16.msra.mxu0 %v3686_v15  ;;  %v693_v40 = vlaneseq }
 0x128   : > { %1299 = vmatprep.subr.bf16.mxu0 %v3687_v16 }
 0x12a   : > { %1249 = vmatpush1.bf16.msra.mxu1 %v3627_v41  ;;  %v4645_v41 = vshrl.u32 %v693_v40, 7 }
 0x12b   : > { %1250 = vmatprep.subr.bf16.mxu1 %v3632_v42  ;;  %1300 = vmatpush1.bf16.msra.mxu0 %v3689_v17 }
 0x12c   : > { %1301 = vmatprep.subr.bf16.mxu0 %v3690_v18  ;;  %v4648_v42 = vsub.s32 0, %v4645_v41  ;;  %v711_v6 = vsub.s32 4, %v4645_v41  ;;  %v715_v7 = vsub.s32 5, %v4645_v41 }
 0x12e   : > { %1251 = vmatpush1.bf16.msra.mxu1 %v3630_v43  ;;  %v691_v43 = vld [vmem:[%s4832_s3] sm:$0x3f] }
 0x12f   : > { %1252 = vmatprep.subr.bf16.mxu1 %v3635_v44  ;;  %1302 = vmatpush1.bf16.msra.mxu0 %v3692_v19  ;;  %v696_v44 = vrot.slane %v691_v43, %v4648_v42  ;;  %v712_v8 = vrot.slane %v691_v43, %v711_v6  ;;  %v716_v9 = vrot.slane %v691_v43, %v715_v7 }
 0x130   : > { %1303 = vmatprep.subr.bf16.mxu0 %v3693_v20  ;;  %v3424_v20 = vld [vmem:[%s4616_s7] sm:$0xff]   ;;  %s4894_s7 = sld [smem:[#allocation29_spill]] }
 0x132   : > { %1253 = vmatpush1.bf16.msra.mxu1 %v3633_v45 }
 0x133   : > { %1254 = vmatprep.subr.bf16.mxu1 %v3638_v46  ;;  %1304 = vmatpush1.bf16.msra.mxu0 %v3695_v21  ;;  %v3425_v21 = vunpack.c.l.bf16 %v3424_v20 }
 0x134   : > { %1305 = vmatprep.subr.bf16.mxu0 %v3696_v22 }
 0x136   : > { %1255 = vmatpush1.bf16.msra.mxu1 %v3636_v47 }
 0x137   : > { %1256 = vmatprep.subr.bf16.mxu1 %v3641_v48  ;;  %1306 = vmatpush1.bf16.msra.mxu0 %v3698_v23 }
 0x138   : > { %1307 = vmatprep.subr.bf16.mxu0 %v3699_v24 }
 0x13a   : > { %1257 = vmatpush1.bf16.msra.mxu1 %v3639_v49 }
 0x13b   : > { %1258 = vmatprep.subr.bf16.mxu1 %v3644_v50  ;;  %1308 = vmatpush1.bf16.msra.mxu0 %v3701_v25 }
 0x13c   : > { %1309 = vmatprep.subr.bf16.mxu0 %v3702_v26  ;;  %v3426_v26 = vunpack.c.h.bf16 %v3424_v20 }
 0x13e   : > { %1259 = vmatpush1.bf16.msra.mxu1 %v3642_v51 }
 0x13f   : > { %1260 = vmatprep.subr.bf16.mxu1 %v3647_v52  ;;  %1310 = vmatpush1.bf16.msra.mxu0 %v3704_v27 }
 0x140   : > { %1311 = vmatprep.subr.bf16.mxu0 %v3705_v28 }
 0x142   : > { %1261 = vmatpush1.bf16.msra.mxu1 %v3645_v53 }
 0x143   : > { %1262 = vmatprep.subr.bf16.mxu1 %v3650_v54  ;;  %1312 = vmatpush1.bf16.msra.mxu0 %v3707_v29 }
 0x144   : > { %1313 = vmatprep.subr.bf16.mxu0 %v3708_v30 }
 0x146   : > { %1263 = vmatpush1.bf16.msra.mxu1 %v3648_v55 }
 0x147   : > { %1264 = vmatprep.subr.bf16.mxu1 %v3653_v56  ;;  %1314 = vmatpush1.bf16.msra.mxu0 %v3710_v31  ;;  %v703_v56 = vsub.s32 2, %v4645_v41 }
 0x148   : > { %1315 = vmatprep.subr.bf16.mxu0 %v3711_v32 }
 0x14a   : > { %1265 = vmatpush1.bf16.msra.mxu1 %v3651_v57  ;;  %v707_v57 = vsub.s32 3, %v4645_v41 }
 0x14b   : > { %1266 = vmatprep.subr.bf16.mxu1 %v3656_v58  ;;  %1316 = vmatpush1.bf16.msra.mxu0 %v3713_v33  ;;  %v704_v58 = vrot.slane %v691_v43, %v703_v56 }
 0x14c   : > { %1317 = vmatprep.subr.bf16.mxu0 %v3714_v34 }
 0x14e   : > { %1267 = vmatpush1.bf16.msra.mxu1 %v3654_v59 }
 0x14f   : > { %1268 = vmatprep.subr.bf16.mxu1 %v3659_v60  ;;  %1318 = vmatpush1.bf16.msra.mxu0 %v3716_v35  ;;  %v708_v60 = vrot.slane %v691_v43, %v707_v57 }
 0x150   : > { %1319 = vmatprep.subr.bf16.mxu0 %v3717_v36 }
 0x152   : > { %1269 = vmatpush1.bf16.msra.mxu1 %v3657_v61 }
 0x153   : > { %1270 = vmatprep.subr.bf16.mxu1 %v3662_v62  ;;  %1320 = vmatpush1.bf16.msra.mxu0 %v3719_v37 }
 0x154   : > { %3435 = vmatprep.subr.bf16.mxu0 %v4258_v38 }
 0x156   : > { %1271 = vmatpush1.bf16.msra.mxu1 %v3660_v63  ;;  %1322 = vmatmul.mubr.bf16.vlgmr.msra.gmra.mrb[0].mxu0 %v4638_v39 }
 0x157   : > { %1272 = vmatprep.subr.bf16.mxu1 %v3665_v0  ;;  %3437 = vmatprep.mubr.msk.bf16.mxu0 %vm4259_vm0, %v4258_v38 }
 0x15a   : > { %1273 = vmatpush1.bf16.msra.mxu1 %v3663_v1 }
 0x15b   : > { %1274 = vmatprep.subr.bf16.mxu1 %v3668_v2 }
 0x15e   : > { %1275 = vmatpush1.bf16.msra.mxu1 %v3666_v3 }
 0x15f   : > { %1276 = vmatprep.subr.bf16.mxu1 %v3671_v4 }
 0x162   : > { %1277 = vmatpush1.bf16.msra.mxu1 %v3669_v5 }
 0x163   : > { %3447 = vmatprep.subr.bf16.mxu1 %v4258_v38 }
 0x165   : > { %1279 = vmatmul.mubr.bf16.vlgmr.msra.gmra.mrb[4].mxu1 %v4638_v39  ;;  %v4654_v39 = vsub.s32 1, %v4645_v41 }
 0x166   : > { %3449 = vmatprep.mubr.msk.bf16.mxu1 %vm4259_vm0, %v4258_v38 }
 0x167   : > { %v700_v46 = vrot.slane %v691_v43, %v4654_v39 }
 0x1f8   : > { %v1237_v45 = vpop.f32.mrb[0].mxu1 }
 0x1f9   : > { %v1238_v47 = vadd.f32 %v1237_v45, %v696_v44  ;;  %v1239_v48 = vpop.f32.mrb[1].mxu1 }
 0x1fa   : > { %v1241_v49 = vpop.f32.mrb[2].mxu1  ;;  %v1240_v52 = vadd.f32 %v1239_v48, %v700_v46 }
 0x1fb   : > { %v1242_v50 = vadd.f32 %v1241_v49, %v696_v44  ;;  %v1243_v51 = vpop.f32.mrb[3].mxu1 }
 0x1fc   : > { %v1244_v53 = vadd.f32 %v1243_v51, %v700_v46 }
 0x1fd   : > { %v1332_v54 = vpack.c.bf16 %v1242_v50, %v1238_v47 }
 0x1fe   : > { %v1333_v55 = vpack.c.bf16 %v1244_v53, %v1240_v52 }
 0x229   : > { %v1323_v10 = vpop.f32.mrb[0].mxu0 }
 0x22a   : > { %v1324_v11 = vadd.f32 %v1323_v10, %v712_v8  ;;  %v1325_v12 = vpop.f32.mrb[1].mxu0 }
 0x22b   : > { %v1326_v13 = vadd.f32 %v1325_v12, %v716_v9  ;;  %v1327_v14 = vpop.f32.mrb[2].mxu0 }
 0x22c   : > { %v1328_v15 = vadd.f32 %v1327_v14, %v712_v8  ;;  %v1329_v16 = vpop.f32.mrb[3].mxu0  ;;  %v3720_v14 = vld [vmem:[#allocation8 + $0x80] ss:$8 sps:$4 sm:$0xff]  }
 0x22d   : > { %v1330_v17 = vadd.f32 %v1329_v16, %v716_v9 }
 0x22e   : > { %v1336_v18 = vpack.c.bf16 %v1328_v15, %v1324_v11 }
 0x22f   : > { %v1337_v19 = vpack.c.bf16 %v1330_v17, %v1326_v13  ;;  %v3725_v17 = vld [vmem:[#allocation8 + $0x94] ss:$8 sps:$4 sm:$0xff]  }
 0x238   : > { %v1280_v59 = vpop.f32.mrb[4].mxu1 }
 0x239   : > { %v1282_v61 = vpop.f32.mrb[5].mxu1  ;;  %v1281_v63 = vadd.f32 %v1280_v59, %v704_v58 }
 0x23a   : > { %v1284_v62 = vpop.f32.mrb[6].mxu1  ;;  %v1283_v2 = vadd.f32 %v1282_v61, %v708_v60 }
 0x23b   : > { %v1285_v0 = vadd.f32 %v1284_v62, %v704_v58  ;;  %v1286_v1 = vpop.f32.mrb[7].mxu1 }
 0x23c   : > { %v1287_v3 = vadd.f32 %v1286_v1, %v708_v60 }
 0x23d   : > { %v1334_v4 = vpack.c.bf16 %v1285_v0, %v1281_v63 }
 0x23e   : > { %v1335_v5 = vpack.c.bf16 %v1287_v3, %v1283_v2 }
 0x23f   : > { %3436 = vmatpush3.bf16.xpose.msra.mxu0 %v1334_v4  ;;  %v3722_v4 = vld [vmem:[#allocation8 + $0x84] ss:$8 sps:$4 sm:$0xff]  }
 0x240   : > { %3448 = vmatpush3.bf16.xpose.msra.mxu1 %v1335_v5  ;;  %3441 = vmatprep.subr.bf16.mxu0 %v4258_v38 }
 0x241   : > { %3453 = vmatprep.subr.bf16.mxu1 %v4258_v38 }
 0x246   : > { %3438 = vmatmul.mubr.bf16.vlgmr.msra.gmra.mrb[4].mxu0 %v1332_v54 }
 0x247   : > { %3450 = vmatmul.mubr.bf16.vlgmr.msra.gmra.mrb[8].mxu1 %v1333_v55  ;;  %3443 = vmatprep.mubr.msk.bf16.mxu0 %vm4259_vm0, %v4258_v38 }
 0x248   : > { %3455 = vmatprep.mubr.msk.bf16.mxu1 %vm4259_vm0, %v4258_v38  ;;  %3442 = vmatpush3.bf16.msra.mxu0 %v1336_v18 }
 0x249   : > { %3454 = vmatpush3.bf16.msra.mxu1 %v1337_v19 }
 0x24a   : > { %1677 = vmatprep.subr.bf16.mxu1 %v3722_v4 }
 0x319   : > { %v1404_v22 = vpop.f32.mrb[4].mxu0 }
 0x31a   : > { %v1411_v23 = vmul.f32 0.088388346, %v1404_v22  ;;  %v3439_v24 = vpop.f32.mrb[5].mxu0  ;;  %v1518_v25 = vpop.f32.mrb[8].mxu1  ;;  %v3728_v22 = vld [vmem:[#allocation8 + $0xa4] ss:$8 sps:$4 sm:$0xff]  }
 0x31b   : > { %v1525_v27 = vmul.f32 0.088388346, %v1518_v25  ;;  %v1407_v28 = vpop.f32.mrb[6].mxu0  ;;  %v3451_v29 = vpop.f32.mrb[9].mxu1  ;;  %v3731_v24 = vld [vmem:[#allocation8 + $0xb4] ss:$8 sps:$4 sm:$0xff]  }
 0x31c   : > { %v1412_v30 = vmul.f32 0.088388346, %v1407_v28  ;;  %v3440_v31 = vpop.f32.mrb[7].mxu0  ;;  %v1521_v32 = vpop.f32.mrb[10].mxu1  ;;  %v1413_v33 = vadd.f32 %v3425_v21, %v1411_v23  ;;  %v3726_v23 = vld [vmem:[#allocation8 + $0xa0] ss:$8 sps:$4 sm:$0xff]  }
 0x31d   : > { %v1526_v34 = vmul.f32 0.088388346, %v1521_v32  ;;  %v3452_v35 = vpop.f32.mrb[11].mxu1  ;;  %v1527_v36 = vadd.f32 %v3425_v21, %v1525_v27  ;;  %v3723_v21 = vld [vmem:[#allocation8 + $0x90] ss:$8 sps:$4 sm:$0xff]  }
 0x31e   : > { %v1416_v37 = vsel %vm1415_vm1, %v1413_v33, -inf  ;;  %v1414_v38 = vadd.f32 %v3426_v26, %v1412_v30  ;;  %v3729_v25 = vld [vmem:[#allocation8 + $0xb0] ss:$8 sps:$4 sm:$0xff]   ;;  %v3732_v27 = vld [vmem:[#allocation8 + $0xc0] ss:$8 sps:$4 sm:$0xff]   ;;  %v4260_v35 = vmov 0  }
 0x31f   : > { %1417 = vmax.xlane.f32.xlu1 %v1416_v37  ;;  %v1529_v40 = vsel %vm1415_vm1, %v1527_v36, -inf  ;;  %v1528_v43 = vadd.f32 %v3426_v26, %v1526_v34  ;;  %v3734_v26 = vld [vmem:[#allocation8 + $0xc4] ss:$8 sps:$4 sm:$0xff]   ;;  %v3737_v28 = vld [vmem:[#allocation8 + $0xd4] ss:$8 sps:$4 sm:$0xff]  }
 0x320   : > { %1530 = vmax.xlane.f32.xlu0 %v1529_v40  ;;  %v1419_v44 = vsel %vm1415_vm1, %v1414_v38, -inf  ;;  %v3735_v29 = vld [vmem:[#allocation8 + $0xd0] ss:$8 sps:$4 sm:$0xff]   ;;  %v3740_v30 = vld [vmem:[#allocation8 + $0xe4] ss:$8 sps:$4 sm:$0xff]  }
 0x321   : > { %v1532_v45 = vsel %vm1415_vm1, %v1528_v43, -inf  ;;  %v3738_v31 = vld [vmem:[#allocation8 + $0xe0] ss:$8 sps:$4 sm:$0xff]   ;;  %v3743_v32 = vld [vmem:[#allocation8 + $0xf4] ss:$8 sps:$4 sm:$0xff]  }
 0x322   : > { %v3746_v34 = vld [vmem:[#allocation8 + $0x4] ss:$8 sps:$4 sm:$0xff]   ;;  %v3744_v40 = vld [vmem:[#allocation8] ss:$8 sps:$4 sm:$0xff]  }
 0x323   : > { %1420 = vmax.xlane.f32.xlu1 %v1419_v44 }
 0x324   : > { %1533 = vmax.xlane.f32.xlu0 %v1532_v45 }
 0x3ac   : > { %v1418_v46 = vpop.xlane.xlu1 %1417 }
 0x3ad   : > { %v1422_v47 = vsub.f32 %v1413_v33, %v1418_v46  ;;  %v1531_v48 = vpop.xlane.xlu0 %1530  ;;  %v3741_v33 = vld [vmem:[#allocation8 + $0xf0] ss:$8 sps:$4 sm:$0xff]   ;;  %v3749_v46 = vld [vmem:[#allocation8 + $0x14] ss:$8 sps:$4 sm:$0xff]  }
 0x3ae   : > { %v1535_v49 = vsub.f32 %v1527_v36, %v1531_v48 }
 0x3af   : > { %v1424_v50 = vmul.f32 1.442695, %v1422_v47 }
 0x3b0   : > { %v1537_v51 = vmul.f32 1.442695, %v1535_v49  ;;  %v1421_v52 = vpop.xlane.xlu1 %1420 }
 0x3b1   : > { %v1423_v53 = vsub.f32 %v1414_v38, %v1421_v52  ;;  %v1534_v54 = vpop.xlane.xlu0 %1533  ;;  %v3752_v52 = vld [vmem:[#allocation8 + $0x24] ss:$8 sps:$4 sm:$0xff]  }
 0x3b2   : > { %3960 = vpow2.f32 %v1537_v51  ;;  %v1536_v55 = vsub.f32 %v1528_v43, %v1534_v54  ;;  %v3747_v51 = vld [vmem:[#allocation8 + $0x10] ss:$8 sps:$4 sm:$0xff]   ;;  %v3755_v54 = vld [vmem:[#allocation8 + $0x34] ss:$8 sps:$4 sm:$0xff]  }
 0x3b3   : > { %3962 = vpow2.f32 %v1424_v50  ;;  %v1426_v58 = vmul.f32 1.442695, %v1423_v53  ;;  %v3750_v53 = vld [vmem:[#allocation8 + $0x20] ss:$8 sps:$4 sm:$0xff]  }
 0x3b4   : > { %v1539_v59 = vmul.f32 1.442695, %v1536_v55  ;;  %v3753_v55 = vld [vmem:[#allocation8 + $0x30] ss:$8 sps:$4 sm:$0xff]  }
 0x3b6   : > { %3964 = vpow2.f32 %v1539_v59  ;;  %v3756_v59 = vld [vmem:[#allocation8 + $0x40] ss:$8 sps:$4 sm:$0xff]  }
 0x3b7   : > { %3966 = vpow2.f32 %v1426_v58  ;;  %v3758_v58 = vld [vmem:[#allocation8 + $0x44] ss:$8 sps:$4 sm:$0xff]  }
 0x3bc   : > { %v3961_v60 = vpop.eup %3960 }
 0x3bd   : > { %v1541_v61 = vsel %vm1415_vm1, %v3961_v60, 0.0  ;;  %v3963_v62 = vpop.eup %3962 }
 0x3be   : > { %1542 = vadd.xlane.f32.xlu0 %v1541_v61  ;;  %v1428_v0 = vsel %vm1415_vm1, %v3963_v62, 0.0  ;;  %v3759_v61 = vld [vmem:[#allocation8 + $0x50] ss:$8 sps:$4 sm:$0xff]  }
 0x3c0   : > { %v3965_v63 = vpop.eup %3964 }
 0x3c1   : > { %v1544_v1 = vsel %vm1415_vm1, %v3965_v63, 0.0  ;;  %v3967_v2 = vpop.eup %3966 }
 0x3c2   : > { %1429 = vadd.xlane.f32.xlu0 %v1428_v0  ;;  %1545 = vadd.xlane.f32.xlu1 %v1544_v1  ;;  %v1431_v3 = vsel %vm1415_vm1, %v3967_v2, 0.0  ;;  %v3767_v0 = vld [vmem:[#allocation8 + $0x74] ss:$8 sps:$4 sm:$0xff]   ;;  %v3765_v1 = vld [vmem:[#allocation8 + $0x70] ss:$8 sps:$4 sm:$0xff]  }
 0x3c6   : > { %1432 = vadd.xlane.f32.xlu1 %v1431_v3 }
 0x44b   : > { %v1543_v5 = vpop.xlane.xlu0 %1542 }
 0x44c   : > { %3968 = vrcp.f32 %v1543_v5 }
 0x44f   : > { %v1430_v6 = vpop.xlane.xlu0 %1429  ;;  %v1546_v7 = vpop.xlane.xlu1 %1545 }
 0x450   : > { %3970 = vrcp.f32 %v1546_v7 }
 0x451   : > { %3972 = vrcp.f32 %v1430_v6 }
 0x453   : > { %v1433_v8 = vpop.xlane.xlu1 %1432 }
 0x454   : > { %3974 = vrcp.f32 %v1433_v8 }
 0x456   : > { %v3969_v9 = vpop.eup %3968 }
 0x457   : > { %v1549_v12 = vmul.f32 %v3969_v9, %v3961_v60  ;;  %v3761_v60 = vld [vmem:[#allocation8 + $0x54] ss:$8 sps:$4 sm:$0xff]  }
 0x45a   : > { %v3971_v10 = vpop.eup %3970 }
 0x45b   : > { %v3973_v11 = vpop.eup %3972  ;;  %v1550_v13 = vmul.f32 %v3971_v10, %v3965_v63  ;;  %v3762_v63 = vld [vmem:[#allocation8 + $0x60] ss:$8 sps:$4 sm:$0xff]   ;;  %v3984_v10 = vld [vmem:[%s4608_s2] sm:$0xff] }
 0x45c   : > { %v1436_v18 = vmul.f32 %v3973_v11, %v3963_v62  ;;  %v3764_v62 = vld [vmem:[#allocation8 + $0x64] ss:$8 sps:$4 sm:$0xff]  }
 0x45d   : > { %v1551_v16 = vpack.c.bf16 %v1550_v13, %v1549_v12 }
 0x45e   : > { %v3975_v15 = vpop.eup %3974 }
 0x45f   : > { %v1437_v19 = vmul.f32 %v3975_v15, %v3967_v2  ;;  %3456 = vmatmul.mubr.msk.bf16.vlgmr.msra.gmra.mrb[12].mxu1 %vm1415_vm1, %v1551_v16  ;;  %v1843_v2 = vld [vmem:[%s4834_s5] sm:$0x3] }
 0x460   : > { %1678 = vmatpush1.bf16.msra.mxu1 %v3720_v14  ;;  %1709 = vmatprep.mubr.bf16.mxu1 %v4260_v35  ;;  %v1848_v3 = vrot.slane %v1843_v2, %v4648_v42  ;;  %v1852_v4 = vrot.slane %v1843_v2, %v4654_v39  ;;  %v3985_v14 = vld [vmem:[%s4608_s2 + $0x8] sm:$0xff]  ;;  %v3822_v2 = vld [vmem:[#allocation10 + $0x120] ss:$16 sps:$4 sm:$0xff]  }
 0x461   : > { %v1438_v20 = vpack.c.bf16 %v1437_v19, %v1436_v18  ;;  %1679 = vmatprep.subr.bf16.mxu1 %v3725_v17  ;;  %v3986_v17 = vld [vmem:[%s4608_s2 + $0x10] sm:$0xff]  ;;  %v3987_v19 = vld [vmem:[%s4608_s2 + $0x18] sm:$0xff] }
 0x463   : > { %3444 = vmatmul.mubr.msk.bf16.vlgmr.msra.gmra.mrb[8].mxu0 %vm1415_vm1, %v1438_v20 }
 0x464   : > { %1680 = vmatpush1.bf16.msra.mxu1 %v3723_v21 }
 0x465   : > { %1681 = vmatprep.subr.bf16.mxu1 %v3728_v22 }
 0x468   : > { %1682 = vmatpush1.bf16.msra.mxu1 %v3726_v23  ;;  %v3768_v23 = vld [vmem:[#allocation10] ss:$16 sps:$4 sm:$0xff]  }
 0x469   : > { %1683 = vmatprep.subr.bf16.mxu1 %v3731_v24  ;;  %v3770_v24 = vld [vmem:[#allocation10 + $0x4] ss:$16 sps:$4 sm:$0xff]  }
 0x46a   : > { %2336 = vmatprep.subr.bf16.mxu0 %v3770_v24  ;;  %v3834_v24 = vld [vmem:[#allocation10 + $0x160] ss:$16 sps:$4 sm:$0xff]  }
 0x46b   : > { %2337 = vmatpush1.bf16.msra.mxu0 %v3768_v23  ;;  %v3839_v23 = vld [vmem:[#allocation10 + $0x16c] ss:$16 sps:$4 sm:$0xff]  }
 0x46c   : > { %1684 = vmatpush1.bf16.msra.mxu1 %v3729_v25  ;;  %v3771_v25 = vld [vmem:[#allocation10 + $0x8] ss:$16 sps:$4 sm:$0xff]  }
 0x46d   : > { %1685 = vmatprep.subr.bf16.mxu1 %v3734_v26  ;;  %v3773_v26 = vld [vmem:[#allocation10 + $0xc] ss:$16 sps:$4 sm:$0xff]  }
 0x470   : > { %1686 = vmatpush1.bf16.msra.mxu1 %v3732_v27  ;;  %v3776_v27 = vld [vmem:[#allocation10 + $0x24] ss:$16 sps:$4 sm:$0xff]  }
 0x471   : > { %1687 = vmatprep.subr.bf16.mxu1 %v3737_v28  ;;  %v3779_v28 = vld [vmem:[#allocation10 + $0x2c] ss:$16 sps:$4 sm:$0xff]   ;;  %2338 = vmatprep.subr.bf16.mxu0 %v3776_v27 }
 0x472   : > { %v3845_v27 = vld [vmem:[#allocation10 + $0x18c] ss:$16 sps:$4 sm:$0xff]  }
 0x474   : > { %1688 = vmatpush1.bf16.msra.mxu1 %v3735_v29  ;;  %v3774_v29 = vld [vmem:[#allocation10 + $0x20] ss:$16 sps:$4 sm:$0xff]  }
 0x475   : > { %1689 = vmatprep.subr.bf16.mxu1 %v3740_v30  ;;  %v3777_v30 = vld [vmem:[#allocation10 + $0x28] ss:$16 sps:$4 sm:$0xff]   ;;  %2339 = vmatpush1.bf16.msra.mxu0 %v3774_v29 }
 0x476   : > { %v3843_v29 = vld [vmem:[#allocation10 + $0x188] ss:$16 sps:$4 sm:$0xff]  }
 0x478   : > { %1690 = vmatpush1.bf16.msra.mxu1 %v3738_v31  ;;  %v3782_v31 = vld [vmem:[#allocation10 + $0x44] ss:$16 sps:$4 sm:$0xff]  }
 0x479   : > { %1691 = vmatprep.subr.bf16.mxu1 %v3743_v32  ;;  %v3785_v32 = vld [vmem:[#allocation10 + $0x4c] ss:$16 sps:$4 sm:$0xff]   ;;  %2340 = vmatprep.subr.bf16.mxu0 %v3782_v31 }
 0x47a   : > { %v3851_v31 = vld [vmem:[#allocation10 + $0x1ac] ss:$16 sps:$4 sm:$0xff]  }
 0x47c   : > { %1692 = vmatpush1.bf16.msra.mxu1 %v3741_v33  ;;  %v3780_v33 = vld [vmem:[#allocation10 + $0x40] ss:$16 sps:$4 sm:$0xff]  }
 0x47d   : > { %1800 = vmatprep.subr.bf16.mxu1 %v3746_v34  ;;  %v3783_v34 = vld [vmem:[#allocation10 + $0x48] ss:$16 sps:$4 sm:$0xff]   ;;  %2341 = vmatpush1.bf16.msra.mxu0 %v3780_v33 }
 0x47e   : > { %v3849_v33 = vld [vmem:[#allocation10 + $0x1a8] ss:$16 sps:$4 sm:$0xff]  }
 0x532   : > { %v1589_v36 = vpop.f32.mrb[12].mxu1 }
 0x533   : > { %v3457_v37 = vpop.f32.mrb[13].mxu1 }
 0x534   : > { %v1592_v38 = vpop.f32.mrb[14].mxu1  ;;  %v3786_v37 = vld [vmem:[#allocation10 + $0x60] ss:$16 sps:$4 sm:$0xff]  }
 0x535   : > { %v1596_v43 = vpack.c.bf16 %v1592_v38, %v1589_v36  ;;  %v3458_v44 = vpop.f32.mrb[15].mxu1  ;;  %v3791_v36 = vld [vmem:[#allocation10 + $0x6c] ss:$16 sps:$4 sm:$0xff]   ;;  %v3789_v38 = vld [vmem:[#allocation10 + $0x68] ss:$16 sps:$4 sm:$0xff]  }
 0x536   : > { %v1476_v45 = vpop.f32.mrb[8].mxu0  ;;  %v3792_v44 = vld [vmem:[#allocation10 + $0x80] ss:$16 sps:$4 sm:$0xff]  }
 0x537   : > { %v3445_v47 = vpop.f32.mrb[9].mxu0  ;;  %1710 = vmatmul.mubr.bf16.vlgmr.msra.gmra.mrb[16].mxu1 %v1596_v43  ;;  %v3797_v43 = vld [vmem:[#allocation10 + $0x8c] ss:$16 sps:$4 sm:$0xff]  }
 0x538   : > { %v1479_v48 = vpop.f32.mrb[10].mxu0  ;;  %1801 = vmatpush1.bf16.msra.mxu1 %v3744_v40  ;;  %1832 = vmatprep.mubr.bf16.mxu1 %v4260_v35  ;;  %v3788_v35 = vld [vmem:[#allocation10 + $0x64] ss:$16 sps:$4 sm:$0xff]   ;;  %v3803_v47 = vld [vmem:[#allocation10 + $0xac] ss:$16 sps:$4 sm:$0xff]  }
 0x539   : > { %v1483_v49 = vpack.c.bf16 %v1479_v48, %v1476_v45  ;;  %v3446_v50 = vpop.f32.mrb[11].mxu0  ;;  %1802 = vmatprep.subr.bf16.mxu1 %v3749_v46  ;;  %2342 = vmatprep.subr.bf16.mxu0 %v3788_v35  ;;  %v3794_v40 = vld [vmem:[#allocation10 + $0x84] ss:$16 sps:$4 sm:$0xff]   ;;  %v3795_v45 = vld [vmem:[#allocation10 + $0x88] ss:$16 sps:$4 sm:$0xff]  }
 0x53a   : > { %2343 = vmatpush1.bf16.msra.mxu0 %v3786_v37  ;;  %v3800_v46 = vld [vmem:[#allocation10 + $0xa4] ss:$16 sps:$4 sm:$0xff]   ;;  %v3798_v48 = vld [vmem:[#allocation10 + $0xa0] ss:$16 sps:$4 sm:$0xff]   ;;  %v3857_v35 = vld [vmem:[#allocation10 + $0x1cc] ss:$16 sps:$4 sm:$0xff]  }
 0x53b   : > { %2344 = vmatprep.subr.bf16.mxu0 %v3794_v40  ;;  %v3806_v50 = vld [vmem:[#allocation10 + $0xc4] ss:$16 sps:$4 sm:$0xff]   ;;  %v3855_v37 = vld [vmem:[#allocation10 + $0x1c8] ss:$16 sps:$4 sm:$0xff]   ;;  %v3863_v40 = vld [vmem:[#allocation10 + $0x1ec] ss:$16 sps:$4 sm:$0xff]  }
 0x53c   : > { %1803 = vmatpush1.bf16.msra.mxu1 %v3747_v51  ;;  %v3809_v51 = vld [vmem:[#allocation10 + $0xcc] ss:$16 sps:$4 sm:$0xff]  }
 0x53d   : > { %1804 = vmatprep.subr.bf16.mxu1 %v3752_v52  ;;  %v3804_v52 = vld [vmem:[#allocation10 + $0xc0] ss:$16 sps:$4 sm:$0xff]  }
 0x53e   : > { %2345 = vmatpush1.bf16.msra.mxu0 %v3792_v44  ;;  %v3861_v44 = vld [vmem:[#allocation10 + $0x1e8] ss:$16 sps:$4 sm:$0xff]  }
 0x53f   : > { %2346 = vmatprep.subr.bf16.mxu0 %v3800_v46 }
 0x540   : > { %1805 = vmatpush1.bf16.msra.mxu1 %v3750_v53  ;;  %v3807_v53 = vld [vmem:[#allocation10 + $0xc8] ss:$16 sps:$4 sm:$0xff]  }
 0x541   : > { %1806 = vmatprep.subr.bf16.mxu1 %v3755_v54  ;;  %v3812_v54 = vld [vmem:[#allocation10 + $0xe4] ss:$16 sps:$4 sm:$0xff]  }
 0x542   : > { %2347 = vmatpush1.bf16.msra.mxu0 %v3798_v48 }
 0x543   : > { %2348 = vmatprep.subr.bf16.mxu0 %v3806_v50 }
 0x544   : > { %1807 = vmatpush1.bf16.msra.mxu1 %v3753_v55  ;;  %v3815_v55 = vld [vmem:[#allocation10 + $0xec] ss:$16 sps:$4 sm:$0xff]  }
 0x545   : > { %1808 = vmatprep.subr.bf16.mxu1 %v3758_v58  ;;  %v3810_v58 = vld [vmem:[#allocation10 + $0xe0] ss:$16 sps:$4 sm:$0xff]  }
 0x546   : > { %2349 = vmatpush1.bf16.msra.mxu0 %v3804_v52  ;;  %v1863_v52 = vld [vmem:[%s4839_s10] sm:$0x3] }
 0x547   : > { %2350 = vmatprep.subr.bf16.mxu0 %v3812_v54  ;;  %v1902_v54 = vrot.slane %v1863_v52, %v4648_v42 }
 0x548   : > { %1809 = vmatpush1.bf16.msra.mxu1 %v3756_v59  ;;  %v3813_v59 = vld [vmem:[#allocation10 + $0xe8] ss:$16 sps:$4 sm:$0xff]  }
 0x549   : > { %1810 = vmatprep.subr.bf16.mxu1 %v3761_v60  ;;  %v3818_v60 = vld [vmem:[#allocation10 + $0x104] ss:$16 sps:$4 sm:$0xff]  }
 0x54a   : > { %2351 = vmatpush1.bf16.msra.mxu0 %v3810_v58 }
 0x54b   : > { %2352 = vmatprep.subr.bf16.mxu0 %v3818_v60 }
 0x54c   : > { %1811 = vmatpush1.bf16.msra.mxu1 %v3759_v61  ;;  %v3821_v61 = vld [vmem:[#allocation10 + $0x10c] ss:$16 sps:$4 sm:$0xff]  }
 0x54d   : > { %1812 = vmatprep.subr.bf16.mxu1 %v3764_v62  ;;  %v3816_v62 = vld [vmem:[#allocation10 + $0x100] ss:$16 sps:$4 sm:$0xff]  }
 0x54e   : > { %2353 = vmatpush1.bf16.msra.mxu0 %v3816_v62 }
 0x550   : > { %1813 = vmatpush1.bf16.msra.mxu1 %v3762_v63  ;;  %v3819_v63 = vld [vmem:[#allocation10 + $0x108] ss:$16 sps:$4 sm:$0xff]  }
 0x551   : > { %1814 = vmatprep.subr.bf16.mxu1 %v3767_v0  ;;  %v3824_v0 = vld [vmem:[#allocation10 + $0x124] ss:$16 sps:$4 sm:$0xff]  }
 0x552   : > { %2354 = vmatprep.subr.bf16.mxu0 %v3824_v0 }
 0x553   : > { %2355 = vmatpush1.bf16.msra.mxu0 %v3822_v2 }
 0x554   : > { %1815 = vmatpush1.bf16.msra.mxu1 %v3765_v1  ;;  %v3827_v1 = vld [vmem:[#allocation10 + $0x12c] ss:$16 sps:$4 sm:$0xff]  }
 0x555   : > { %2379 = vmatprep.subr.bf16.mxu1 %v3773_v26  ;;  %v3842_v26 = vld [vmem:[#allocation10 + $0x184] ss:$16 sps:$4 sm:$0xff]  }
 0x557   : > { %1833 = vmatmul.mubr.bf16.vlgmr.msra.gmra.mrb[16].mxu1 %v1483_v49  ;;  %v3801_v49 = vld [vmem:[#allocation10 + $0xa8] ss:$16 sps:$4 sm:$0xff]  }
 0x558   : > { %2380 = vmatpush1.bf16.msra.mxu1 %v3771_v25  ;;  %v3837_v25 = vld [vmem:[#allocation10 + $0x168] ss:$16 sps:$4 sm:$0xff]  }
 0x559   : > { %2381 = vmatprep.subr.bf16.mxu1 %v3779_v28  ;;  %v3840_v28 = vld [vmem:[#allocation10 + $0x180] ss:$16 sps:$4 sm:$0xff]  }
 0x55c   : > { %2382 = vmatpush1.bf16.msra.mxu1 %v3777_v30  ;;  %v3848_v30 = vld [vmem:[#allocation10 + $0x1a4] ss:$16 sps:$4 sm:$0xff]  }
 0x55d   : > { %2383 = vmatprep.subr.bf16.mxu1 %v3785_v32  ;;  %v3846_v32 = vld [vmem:[#allocation10 + $0x1a0] ss:$16 sps:$4 sm:$0xff]  }
 0x560   : > { %2384 = vmatpush1.bf16.msra.mxu1 %v3783_v34  ;;  %v3854_v34 = vld [vmem:[#allocation10 + $0x1c4] ss:$16 sps:$4 sm:$0xff]  }
 0x561   : > { %2385 = vmatprep.subr.bf16.mxu1 %v3791_v36  ;;  %v3852_v36 = vld [vmem:[#allocation10 + $0x1c0] ss:$16 sps:$4 sm:$0xff]  }
 0x564   : > { %2386 = vmatpush1.bf16.msra.mxu1 %v3789_v38  ;;  %v3860_v38 = vld [vmem:[#allocation10 + $0x1e4] ss:$16 sps:$4 sm:$0xff]  }
 0x565   : > { %2387 = vmatprep.subr.bf16.mxu1 %v3797_v43  ;;  %v3858_v43 = vld [vmem:[#allocation10 + $0x1e0] ss:$16 sps:$4 sm:$0xff]  }
 0x568   : > { %2388 = vmatpush1.bf16.msra.mxu1 %v3795_v45  ;;  %v3866_v45 = vld [vmem:[#allocation11 + $0x4] ss:$8 sps:$4 sm:$0xff]  }
 0x569   : > { %2389 = vmatprep.subr.bf16.mxu1 %v3803_v47 }
 0x56c   : > { %2390 = vmatpush1.bf16.msra.mxu1 %v3801_v49 }
 0x56d   : > { %2391 = vmatprep.subr.bf16.mxu1 %v3809_v51 }
 0x570   : > { %2392 = vmatpush1.bf16.msra.mxu1 %v3807_v53  ;;  %v1864_v53 = vld [vmem:[%s4840_s11] sm:$0x3] }
 0x571   : > { %2393 = vmatprep.subr.bf16.mxu1 %v3815_v55  ;;  %v1906_v55 = vrot.slane %v1863_v52, %v4654_v39  ;;  %v1917_v62 = vrot.slane %v1864_v53, %v4648_v42 }
 0x574   : > { %2394 = vmatpush1.bf16.msra.mxu1 %v3813_v59 }
 0x575   : > { %2395 = vmatprep.subr.bf16.mxu1 %v3821_v61 }
 0x578   : > { %2396 = vmatpush1.bf16.msra.mxu1 %v3819_v63  ;;  %v1921_v63 = vrot.slane %v1864_v53, %v4654_v39 }
 0x579   : > { %2397 = vmatprep.subr.bf16.mxu1 %v3827_v1 }
 0x62a   : > { %v1834_v5 = vpop.f32.mrb[16].mxu1 }
 0x62b   : > { %v1855_v6 = vadd.f32 %v1848_v3, %v1834_v5  ;;  %v1836_v7 = vpop.f32.mrb[17].mxu1 }
 0x62c   : > { %v1856_v8 = vadd.f32 %v1852_v4, %v1836_v7  ;;  %v1838_v9 = vpop.f32.mrb[18].mxu1 }
 0x62d   : > { %v4685_v11 = vadd.f32 %v3984_v10, %v1855_v6  ;;  %v1857_v12 = vadd.f32 %v1848_v3, %v1838_v9  ;;  %v1840_v13 = vpop.f32.mrb[19].mxu1  ;;  %v3825_v3 = vld [vmem:[#allocation10 + $0x128] ss:$16 sps:$4 sm:$0xff]  }
 0x62e   : > { %v4688_v15 = vadd.f32 %v3985_v14, %v1856_v8  ;;  %v1858_v16 = vadd.f32 %v1852_v4, %v1840_v13  ;;  %2398 = vmatpush1.bf16.msra.mxu1 %v3825_v3 }
 0x62f   : > { %v4691_v18 = vadd.f32 %v3986_v17, %v1857_v12 }
 0x630   : > { %v4694_v20 = vadd.f32 %v3987_v19, %v1858_v16  ;;  %v1865_v21 = vadd.f32 %v4688_v15, %v4685_v11  ;;  %v3833_v19 = vld [vmem:[#allocation10 + $0x14c] ss:$16 sps:$4 sm:$0xff]  }
 0x631   : > { %2399 = vmatprep.subr.bf16.mxu1 %v3833_v19  ;;  %v3878_v19 = vld [vmem:[#allocation11 + $0x44] ss:$8 sps:$4 sm:$0xff]  }
 0x632   : > { %1866 = vadd.xlane.f32.xlu0 %v1865_v21  ;;  %v1868_v22 = vadd.f32 %v4694_v20, %v4691_v18  ;;  %v3831_v21 = vld [vmem:[#allocation10 + $0x148] ss:$16 sps:$4 sm:$0xff]  }
 0x633   : > { %2400 = vmatpush1.bf16.msra.mxu1 %v3831_v21  ;;  %v3881_v21 = vld [vmem:[#allocation11 + $0x54] ss:$8 sps:$4 sm:$0xff]  }
 0x634   : > { %1869 = vadd.xlane.f32.xlu1 %v1868_v22  ;;  %v3836_v22 = vld [vmem:[#allocation10 + $0x164] ss:$16 sps:$4 sm:$0xff]   ;;  %2401 = vmatprep.subr.bf16.mxu1 %v3839_v23 }
 0x635   : > { %v3884_v23 = vld [vmem:[#allocation11 + $0x64] ss:$8 sps:$4 sm:$0xff]  }
 0x637   : > { %2402 = vmatpush1.bf16.msra.mxu1 %v3837_v25  ;;  %v3887_v25 = vld [vmem:[#allocation11 + $0x74] ss:$8 sps:$4 sm:$0xff]  }
 0x638   : > { %2403 = vmatprep.subr.bf16.mxu1 %v3845_v27  ;;  %v3890_v27 = vld [vmem:[#allocation11 + $0x84] ss:$8 sps:$4 sm:$0xff]  }
 0x63b   : > { %2404 = vmatpush1.bf16.msra.mxu1 %v3843_v29  ;;  %v3893_v29 = vld [vmem:[#allocation11 + $0x94] ss:$8 sps:$4 sm:$0xff]  }
 0x63c   : > { %2405 = vmatprep.subr.bf16.mxu1 %v3851_v31  ;;  %v3896_v31 = vld [vmem:[#allocation11 + $0xa4] ss:$8 sps:$4 sm:$0xff]  }
 0x63f   : > { %2406 = vmatpush1.bf16.msra.mxu1 %v3849_v33  ;;  %v3899_v33 = vld [vmem:[#allocation11 + $0xb4] ss:$8 sps:$4 sm:$0xff]  }
 0x640   : > { %2407 = vmatprep.subr.bf16.mxu1 %v3857_v35  ;;  %v3902_v35 = vld [vmem:[#allocation11 + $0xc4] ss:$8 sps:$4 sm:$0xff]  }
 0x643   : > { %2408 = vmatpush1.bf16.msra.mxu1 %v3855_v37  ;;  %v3905_v37 = vld [vmem:[#allocation11 + $0xd4] ss:$8 sps:$4 sm:$0xff]  }
 0x644   : > { %2409 = vmatprep.subr.bf16.mxu1 %v3863_v40  ;;  %v3908_v40 = vld [vmem:[#allocation11 + $0xe4] ss:$8 sps:$4 sm:$0xff]  }
 0x647   : > { %2410 = vmatpush1.bf16.msra.mxu1 %v3861_v44  ;;  %v3911_v44 = vld [vmem:[#allocation11 + $0xf4] ss:$8 sps:$4 sm:$0xff]  }
 0x6bf   : > { %v1867_v4 = vpop.xlane.xlu0 %1866 }
 0x6c0   : > { %v1872_v5 = vmul.f32 0.00390625, %v1867_v4 }
 0x6c1   : > { %v1870_v6 = vpop.xlane.xlu1 %1869 }
 0x6c2   : > { %v4701_v7 = vsub.f32 %v4685_v11, %v1872_v5  ;;  %v4704_v8 = vsub.f32 %v4688_v15, %v1872_v5  ;;  %v1873_v9 = vmul.f32 0.00390625, %v1870_v6 }
 0x6c4   : > { %v4707_v10 = vsub.f32 %v4691_v18, %v1873_v9  ;;  %v4710_v12 = vsub.f32 %v4694_v20, %v1873_v9  ;;  %v1878_v13 = vmul.f32 %v4701_v7, %v4701_v7  ;;  %v1879_v14 = vmul.f32 %v4704_v8, %v4704_v8  ;;  %v3830_v18 = vld [vmem:[#allocation10 + $0x144] ss:$16 sps:$4 sm:$0xff]   ;;  %v3828_v20 = vld [vmem:[#allocation10 + $0x140] ss:$16 sps:$4 sm:$0xff]  }
 0x6c5   : > { %2356 = vmatprep.subr.bf16.mxu0 %v3830_v18  ;;  %v3873_v18 = vld [vmem:[#allocation11 + $0x30] ss:$8 sps:$4 sm:$0xff]  }
 0x6c6   : > { %v1882_v16 = vadd.f32 %v1879_v14, %v1878_v13  ;;  %v1880_v11 = vmul.f32 %v4707_v10, %v4707_v10  ;;  %v1881_v15 = vmul.f32 %v4710_v12, %v4710_v12  ;;  %2357 = vmatpush1.bf16.msra.mxu0 %v3828_v20  ;;  %v3864_v14 = vld [vmem:[#allocation11] ss:$8 sps:$4 sm:$0xff]  }
 0x6c7   : > { %2358 = vmatprep.subr.bf16.mxu0 %v3836_v22  ;;  %v3876_v20 = vld [vmem:[#allocation11 + $0x40] ss:$8 sps:$4 sm:$0xff]   ;;  %v3879_v22 = vld [vmem:[#allocation11 + $0x50] ss:$8 sps:$4 sm:$0xff]  }
 0x6c8   : > { %1883 = vadd.xlane.f32.xlu0 %v1882_v16  ;;  %v1885_v17 = vadd.f32 %v1881_v15, %v1880_v11  ;;  %v3867_v16 = vld [vmem:[#allocation11 + $0x10] ss:$8 sps:$4 sm:$0xff]   ;;  %v3872_v11 = vld [vmem:[#allocation11 + $0x24] ss:$8 sps:$4 sm:$0xff]   ;;  %v3870_v15 = vld [vmem:[#allocation11 + $0x20] ss:$8 sps:$4 sm:$0xff]  }
 0x6ca   : > { %1886 = vadd.xlane.f32.xlu1 %v1885_v17  ;;  %2359 = vmatpush1.bf16.msra.mxu0 %v3834_v24  ;;  %v3875_v17 = vld [vmem:[#allocation11 + $0x34] ss:$8 sps:$4 sm:$0xff]   ;;  %v3882_v24 = vld [vmem:[#allocation11 + $0x60] ss:$8 sps:$4 sm:$0xff]  }
 0x6cb   : > { %2360 = vmatprep.subr.bf16.mxu0 %v3842_v26  ;;  %v3885_v26 = vld [vmem:[#allocation11 + $0x70] ss:$8 sps:$4 sm:$0xff]  }
 0x6ce   : > { %2361 = vmatpush1.bf16.msra.mxu0 %v3840_v28  ;;  %v3888_v28 = vld [vmem:[#allocation11 + $0x80] ss:$8 sps:$4 sm:$0xff]  }
 0x6cf   : > { %2362 = vmatprep.subr.bf16.mxu0 %v3848_v30  ;;  %v3891_v30 = vld [vmem:[#allocation11 + $0x90] ss:$8 sps:$4 sm:$0xff]  }
 0x6d2   : > { %2363 = vmatpush1.bf16.msra.mxu0 %v3846_v32  ;;  %v3894_v32 = vld [vmem:[#allocation11 + $0xa0] ss:$8 sps:$4 sm:$0xff]  }
 0x6d3   : > { %2364 = vmatprep.subr.bf16.mxu0 %v3854_v34  ;;  %v3897_v34 = vld [vmem:[#allocation11 + $0xb0] ss:$8 sps:$4 sm:$0xff]  }
 0x6d6   : > { %2365 = vmatpush1.bf16.msra.mxu0 %v3852_v36  ;;  %v3900_v36 = vld [vmem:[#allocation11 + $0xc0] ss:$8 sps:$4 sm:$0xff]  }
 0x6d7   : > { %2366 = vmatprep.subr.bf16.mxu0 %v3860_v38  ;;  %v3903_v38 = vld [vmem:[#allocation11 + $0xd0] ss:$8 sps:$4 sm:$0xff]  }
 0x6da   : > { %2367 = vmatpush1.bf16.msra.mxu0 %v3858_v43  ;;  %v3906_v43 = vld [vmem:[#allocation11 + $0xe0] ss:$8 sps:$4 sm:$0xff]  }
 0x6db   : > { %2830 = vmatprep.subr.bf16.mxu0 %v3866_v45  ;;  %v3909_v45 = vld [vmem:[#allocation11 + $0xf0] ss:$8 sps:$4 sm:$0xff]  }
 0x755   : > { %v1884_v46 = vpop.xlane.xlu0 %1883 }
 0x756   : > { %v1888_v47 = vmul.f32 0.00390625, %v1884_v46  ;;  %v3914_v46 = vld [vmem:[#allocation11 + $0x104] ss:$8 sps:$4 sm:$0xff]  }
 0x757   : > { %v1887_v48 = vpop.xlane.xlu1 %1886 }
 0x758   : > { %v1890_v49 = vadd.f32 1e-05, %v1888_v47  ;;  %v1889_v50 = vmul.f32 0.00390625, %v1887_v48  ;;  %v1994_v47 = vld [vmem:[%s4892_s18] sm:$0xf]  ;;  %s4261_s18 = smov [#allocation13]  }
 0x759   : > { %v1999_v48 = vrot.slane %v1994_v47, %v4648_v42  ;;  %s4164_s12 = sshll.u32 %s4261_s18, 4  ;;  %s4165_s12 = int_to_ptr.vmem [resolvable:$false] %s4164_s12 }
 0x75a   : > { %3976 = vrsqrt.f32 %v1890_v49  ;;  %v1891_v51 = vadd.f32 1e-05, %v1889_v50  ;;  %v2007_v49 = vrot.slane %v1994_v47, %v703_v56  ;;  %v2003_v50 = vrot.slane %v1994_v47, %v4654_v39  ;;  %s4166_s2 = scalar_lea.vmem %s4165_s12, 1024  ;;  %p4167_p3 = scmp.lt.s32.totalorder %s4785_s4, %s4165_s12 }
 0x75b   : > { %p4168_p5 = scmp.lt.s32.totalorder %s4166_s2, %s4160_s13 }
 0x75c   : > { %3978 = vrsqrt.f32 %v1891_v51  ;;  %v2011_v51 = vrot.slane %v1994_v47, %v707_v57  ;;  %v3953_v47 = vld [vmem:[#allocation11 + $0x1d4] ss:$8 sps:$4 sm:$0xff]  }
 0x75d   : > { %p4169_p9 = por %p4168_p5, %p4167_p3 }
 0x75f   : > { %p4170_p8 = pnand %p4169_p9, %p4163_p6 }
 0x764   : > { %v3977_v58 = vpop.eup %3976 }
 0x765   : > { %v1894_v59 = vmul.f32 %v3977_v58, %v4701_v7  ;;  %v1895_v60 = vmul.f32 %v3977_v58, %v4704_v8 }
 0x766   : > { %v3979_v61 = vpop.eup %3978 }
 0x767   : > { %v1896_v0 = vmul.f32 %v3979_v61, %v4707_v10  ;;  %v1897_v1 = vmul.f32 %v3979_v61, %v4710_v12  ;;  %v1910_v2 = vmul.f32 %v1906_v55, %v1895_v60  ;;  %v1909_v3 = vmul.f32 %v1902_v54, %v1894_v59  ;;  %v3869_v12 = vld [vmem:[#allocation11 + $0x14] ss:$8 sps:$4 sm:$0xff]  }
 0x769   : > { %v1912_v4 = vmul.f32 %v1906_v55, %v1897_v1  ;;  %v1911_v5 = vmul.f32 %v1902_v54, %v1896_v0  ;;  %v4734_v6 = vadd.f32 %v1921_v63, %v1910_v2  ;;  %v4738_v7 = vadd.f32 %v1917_v62, %v1909_v3 }
 0x76b   : > { %v4736_v9 = vadd.f32 %v1921_v63, %v1912_v4  ;;  %v4740_v8 = vadd.f32 %v1917_v62, %v1911_v5 }
 0x76d   : > { %v1929_v13 = vpack.c.bf16 %v4736_v9, %v4734_v6  ;;  %v1928_v10 = vpack.c.bf16 %v4740_v8, %v4738_v7 }
 0x76f   : > { %2368 = vmatprep.mubr.bf16.mxu0 %v1929_v13  ;;  %2411 = vmatprep.mubr.bf16.mxu1 %v1929_v13 }
 0x770   : > { %2369 = vmatmul.mubr.bf16.vlgmr.msra.gmra.mrb[12].mxu0 %v1928_v10  ;;  %2412 = vmatmul.mubr.bf16.vlgmr.msra.gmra.mrb[20].mxu1 %v1928_v10 }
 0x771   : > { %2831 = vmatpush1.bf16.msra.mxu0 %v3864_v14 }
 0x772   : > { %2832 = vmatprep.subr.bf16.mxu0 %v3869_v12 }
 0x775   : > { %2833 = vmatpush1.bf16.msra.mxu0 %v3867_v16 }
 0x776   : > { %2834 = vmatprep.subr.bf16.mxu0 %v3872_v11 }
 0x779   : > { %2835 = vmatpush1.bf16.msra.mxu0 %v3870_v15 }
 0x77a   : > { %2836 = vmatprep.subr.bf16.mxu0 %v3875_v17 }
 0x77d   : > { %2837 = vmatpush1.bf16.msra.mxu0 %v3873_v18 }
 0x77e   : > { %2838 = vmatprep.subr.bf16.mxu0 %v3878_v19  ;;  %v3912_v19 = vld [vmem:[#allocation11 + $0x100] ss:$8 sps:$4 sm:$0xff]  }
 0x781   : > { %2839 = vmatpush1.bf16.msra.mxu0 %v3876_v20  ;;  %v3917_v20 = vld [vmem:[#allocation11 + $0x114] ss:$8 sps:$4 sm:$0xff]  }
 0x782   : > { %2840 = vmatprep.subr.bf16.mxu0 %v3881_v21  ;;  %v3915_v21 = vld [vmem:[#allocation11 + $0x110] ss:$8 sps:$4 sm:$0xff]  }
 0x785   : > { %2841 = vmatpush1.bf16.msra.mxu0 %v3879_v22  ;;  %v3920_v22 = vld [vmem:[#allocation11 + $0x124] ss:$8 sps:$4 sm:$0xff]  }
 0x786   : > { %2842 = vmatprep.subr.bf16.mxu0 %v3884_v23  ;;  %v3918_v23 = vld [vmem:[#allocation11 + $0x120] ss:$8 sps:$4 sm:$0xff]  }
 0x789   : > { %2843 = vmatpush1.bf16.msra.mxu0 %v3882_v24  ;;  %v3923_v24 = vld [vmem:[#allocation11 + $0x134] ss:$8 sps:$4 sm:$0xff]  }
 0x78a   : > { %2844 = vmatprep.subr.bf16.mxu0 %v3887_v25  ;;  %v3921_v25 = vld [vmem:[#allocation11 + $0x130] ss:$8 sps:$4 sm:$0xff]  }
 0x78d   : > { %2845 = vmatpush1.bf16.msra.mxu0 %v3885_v26  ;;  %v3926_v26 = vld [vmem:[#allocation11 + $0x144] ss:$8 sps:$4 sm:$0xff]  }
 0x78e   : > { %2846 = vmatprep.subr.bf16.mxu0 %v3890_v27  ;;  %v3924_v27 = vld [vmem:[#allocation11 + $0x140] ss:$8 sps:$4 sm:$0xff]  }
 0x791   : > { %2847 = vmatpush1.bf16.msra.mxu0 %v3888_v28  ;;  %v3929_v28 = vld [vmem:[#allocation11 + $0x154] ss:$8 sps:$4 sm:$0xff]  }
 0x792   : > { %2848 = vmatprep.subr.bf16.mxu0 %v3893_v29  ;;  %v3927_v29 = vld [vmem:[#allocation11 + $0x150] ss:$8 sps:$4 sm:$0xff]  }
 0x795   : > { %2849 = vmatpush1.bf16.msra.mxu0 %v3891_v30  ;;  %v3932_v30 = vld [vmem:[#allocation11 + $0x164] ss:$8 sps:$4 sm:$0xff]  }
 0x796   : > { %2850 = vmatprep.subr.bf16.mxu0 %v3896_v31  ;;  %v3930_v31 = vld [vmem:[#allocation11 + $0x160] ss:$8 sps:$4 sm:$0xff]  }
 0x799   : > { %2851 = vmatpush1.bf16.msra.mxu0 %v3894_v32  ;;  %v3935_v32 = vld [vmem:[#allocation11 + $0x174] ss:$8 sps:$4 sm:$0xff]  }
 0x79a   : > { %2852 = vmatprep.subr.bf16.mxu0 %v3899_v33  ;;  %v3933_v33 = vld [vmem:[#allocation11 + $0x170] ss:$8 sps:$4 sm:$0xff]  }
 0x79d   : > { %2853 = vmatpush1.bf16.msra.mxu0 %v3897_v34  ;;  %v3938_v34 = vld [vmem:[#allocation11 + $0x184] ss:$8 sps:$4 sm:$0xff]  }
 0x79e   : > { %2854 = vmatprep.subr.bf16.mxu0 %v3902_v35  ;;  %v3936_v35 = vld [vmem:[#allocation11 + $0x180] ss:$8 sps:$4 sm:$0xff]  }
 0x7a1   : > { %2855 = vmatpush1.bf16.msra.mxu0 %v3900_v36  ;;  %v3941_v36 = vld [vmem:[#allocation11 + $0x194] ss:$8 sps:$4 sm:$0xff]  }
 0x7a2   : > { %2856 = vmatprep.subr.bf16.mxu0 %v3905_v37  ;;  %v3939_v37 = vld [vmem:[#allocation11 + $0x190] ss:$8 sps:$4 sm:$0xff]  }
 0x7a5   : > { %2857 = vmatpush1.bf16.msra.mxu0 %v3903_v38  ;;  %v3944_v38 = vld [vmem:[#allocation11 + $0x1a4] ss:$8 sps:$4 sm:$0xff]  }
 0x7a6   : > { %2858 = vmatprep.subr.bf16.mxu0 %v3908_v40  ;;  %v3942_v40 = vld [vmem:[#allocation11 + $0x1a0] ss:$8 sps:$4 sm:$0xff]  }
 0x7a9   : > { %2859 = vmatpush1.bf16.msra.mxu0 %v3906_v43  ;;  %v3947_v43 = vld [vmem:[#allocation11 + $0x1b4] ss:$8 sps:$4 sm:$0xff]  }
 0x7aa   : > { %2860 = vmatprep.subr.bf16.mxu0 %v3911_v44  ;;  %v3945_v44 = vld [vmem:[#allocation11 + $0x1b0] ss:$8 sps:$4 sm:$0xff]  }
 0x7ad   : > { %2861 = vmatpush1.bf16.msra.mxu0 %v3909_v45  ;;  %v3950_v45 = vld [vmem:[#allocation11 + $0x1c4] ss:$8 sps:$4 sm:$0xff]  }
 0x7ae   : > { %2873 = vmatprep.subr.bf16.mxu0 %v3914_v46  ;;  %v3948_v46 = vld [vmem:[#allocation11 + $0x1c0] ss:$8 sps:$4 sm:$0xff]  }
 0x843   : > { %v2370_v52 = vpop.f32.mrb[12].mxu0  ;;  %v2413_v53 = vpop.f32.mrb[20].mxu1 }
 0x844   : > { %v2371_v54 = vadd.f32 %v2370_v52, %v1999_v48  ;;  %v2414_v55 = vadd.f32 %v2413_v53, %v2007_v49  ;;  %v2372_v58 = vpop.f32.mrb[13].mxu0  ;;  %v2415_v59 = vpop.f32.mrb[21].mxu1  ;;  %v3957_v52 = vld [vmem:[#allocation11 + $0x1f0] ss:$8 sps:$4 sm:$0xff]  }
 0x845   : > { %v2373_v60 = vadd.f32 %v2372_v58, %v2003_v50  ;;  %v2416_v61 = vadd.f32 %v2415_v59, %v2011_v51  ;;  %v2374_v62 = vpop.f32.mrb[14].mxu0  ;;  %v2417_v63 = vpop.f32.mrb[22].mxu1  ;;  %v2498_v53 = vld [vmem:[%s4893_s0] sm:$0x3] }
 0x846   : > { %v2375_v0 = vadd.f32 %v2374_v62, %v1999_v48  ;;  %v2418_v1 = vadd.f32 %v2417_v63, %v2007_v49  ;;  %v2376_v2 = vpop.f32.mrb[15].mxu0  ;;  %v2419_v3 = vpop.f32.mrb[23].mxu1  ;;  %v2422_v5 = vmax.f32 %v2371_v54, 0.0  ;;  %v2424_v13 = vmax.f32 %v2414_v55, 0.0  ;;  %v3951_v48 = vld [vmem:[#allocation11 + $0x1d0] ss:$8 sps:$4 sm:$0xff]  }
 0x847   : > { %v2377_v56 = vadd.f32 %v2376_v2, %v2003_v50  ;;  %v2420_v4 = vadd.f32 %v2419_v3, %v2011_v51  ;;  %v2423_v10 = vmax.f32 %v2373_v60, 0.0  ;;  %v2425_v14 = vmax.f32 %v2416_v61, 0.0  ;;  %v3956_v49 = vld [vmem:[#allocation11 + $0x1e4] ss:$8 sps:$4 sm:$0xff]   ;;  %v3954_v50 = vld [vmem:[#allocation11 + $0x1e0] ss:$8 sps:$4 sm:$0xff]  }
 0x848   : > { %v2426_v41 = vmax.f32 %v2375_v0, 0.0  ;;  %v2428_v57 = vmax.f32 %v2418_v1, 0.0  ;;  %v3959_v51 = vld [vmem:[#allocation11 + $0x1f4] ss:$8 sps:$4 sm:$0xff]   ;;  %v2503_v54 = vrot.slane %v2498_v53, %v4648_v42  ;;  %v2507_v55 = vrot.slane %v2498_v53, %v4654_v39 }
 0x849   : > { %v2427_v12 = vmax.f32 %v2377_v56, 0.0  ;;  %v2429_v16 = vmax.f32 %v2420_v4, 0.0 }
 0x84a   : > { %v2430_v11 = vpack.c.bf16 %v2426_v41, %v2422_v5  ;;  %v4755_v15 = vpack.c.bf16 %v2428_v57, %v2424_v13 }
 0x84b   : > { %v2431_v17 = vpack.c.bf16 %v2427_v12, %v2423_v10  ;;  %v2433_v18 = vpack.c.bf16 %v2429_v16, %v2425_v14 }
 0x84d   : > { %2862 = vmatprep.mubr.bf16.mxu0 %v2431_v17 }
 0x84e   : > { %2863 = vmatmul.mubr.bf16.vlgmr.msra.gmra.mrb[16].mxu0 %v2430_v11 }
 0x84f   : > { %2874 = vmatpush1.bf16.msra.mxu0 %v3912_v19  ;;  %2905 = vmatprep.mubr.bf16.mxu0 %v2433_v18 }
 0x850   : > { %2875 = vmatprep.subr.bf16.mxu0 %v3917_v20 }
 0x853   : > { %2876 = vmatpush1.bf16.msra.mxu0 %v3915_v21 }
 0x854   : > { %2877 = vmatprep.subr.bf16.mxu0 %v3920_v22 }
 0x857   : > { %2878 = vmatpush1.bf16.msra.mxu0 %v3918_v23 }
 0x858   : > { %2879 = vmatprep.subr.bf16.mxu0 %v3923_v24 }
 0x85b   : > { %2880 = vmatpush1.bf16.msra.mxu0 %v3921_v25  ;;  %v2920_v25 = vld [vmem:[%s4894_s7] sm:$0x3] }
 0x85c   : > { %2881 = vmatprep.subr.bf16.mxu0 %v3926_v26  ;;  %v2921_v26 = vld [vmem:[%s4895_s20] sm:$0x3] }
 0x85f   : > { %2882 = vmatpush1.bf16.msra.mxu0 %v3924_v27  ;;  %v2958_v27 = vrot.slane %v2920_v25, %v4648_v42 }
 0x860   : > { %2883 = vmatprep.subr.bf16.mxu0 %v3929_v28  ;;  %v2962_v28 = vrot.slane %v2920_v25, %v4654_v39 }
 0x863   : > { %2884 = vmatpush1.bf16.msra.mxu0 %v3927_v29 }
 0x864   : > { %2885 = vmatprep.subr.bf16.mxu0 %v3932_v30  ;;  %v2973_v30 = vrot.slane %v2921_v26, %v4648_v42 }
 0x867   : > { %2886 = vmatpush1.bf16.msra.mxu0 %v3930_v31  ;;  %v2977_v31 = vrot.slane %v2921_v26, %v4654_v39 }
 0x868   : > { %2887 = vmatprep.subr.bf16.mxu0 %v3935_v32 }
 0x86b   : > { %2888 = vmatpush1.bf16.msra.mxu0 %v3933_v33 }
 0x86c   : > { %2889 = vmatprep.subr.bf16.mxu0 %v3938_v34 }
 0x86f   : > { %2890 = vmatpush1.bf16.msra.mxu0 %v3936_v35 }
 0x870   : > { %2891 = vmatprep.subr.bf16.mxu0 %v3941_v36 }
 0x873   : > { %2892 = vmatpush1.bf16.msra.mxu0 %v3939_v37 }
 0x874   : > { %2893 = vmatprep.subr.bf16.mxu0 %v3944_v38 }
 0x877   : > { %2894 = vmatpush1.bf16.msra.mxu0 %v3942_v40 }
 0x878   : > { %2895 = vmatprep.subr.bf16.mxu0 %v3947_v43 }
 0x87b   : > { %2896 = vmatpush1.bf16.msra.mxu0 %v3945_v44 }
 0x87c   : > { %2897 = vmatprep.subr.bf16.mxu0 %v3950_v45 }
 0x87f   : > { %2898 = vmatpush1.bf16.msra.mxu0 %v3948_v46 }
 0x880   : > { %2899 = vmatprep.subr.bf16.mxu0 %v3953_v47 }
 0x883   : > { %2900 = vmatpush1.bf16.msra.mxu0 %v3951_v48 }
 0x884   : > { %2901 = vmatprep.subr.bf16.mxu0 %v3956_v49 }
 0x887   : > { %2902 = vmatpush1.bf16.msra.mxu0 %v3954_v50 }
 0x888   : > { %2903 = vmatprep.subr.bf16.mxu0 %v3959_v51 }
 0x88b   : > { %2904 = vmatpush1.bf16.msra.mxu0 %v3957_v52 }
 0x88e   : > { %2906 = vmatmul.mubr.bf16.vlgmr.msra.gmra.mrb[16].mxu0 %v4755_v15 }
 0x961   : > { %v2907_v58 = vpop.f32.mrb[16].mxu0 }
 0x962   : > { %v3459_v59 = vadd.f32 %v2907_v58, %v2503_v54  ;;  %v2909_v60 = vpop.f32.mrb[17].mxu0 }
 0x963   : > { %v3460_v61 = vadd.f32 %v2909_v60, %v2507_v55  ;;  %v2911_v62 = vpop.f32.mrb[18].mxu0 }
 0x964   : > { %v2916_v63 = vadd.f32 %v3459_v59, %v4738_v7  ;;  %v3461_v0 = vadd.f32 %v2911_v62, %v2503_v54  ;;  %v2913_v1 = vpop.f32.mrb[19].mxu0 }
 0x965   : > { %v2917_v2 = vadd.f32 %v3460_v61, %v4734_v6  ;;  %v3462_v3 = vadd.f32 %v2913_v1, %v2507_v55 }
 0x966   : > { %v2918_v56 = vadd.f32 %v3461_v0, %v4740_v8 }
 0x967   : > { %v2919_v4 = vadd.f32 %v3462_v3, %v4736_v9  ;;  %v2922_v5 = vadd.f32 %v2917_v2, %v2916_v63 }
 0x969   : > { %2923 = vadd.xlane.f32.xlu0 %v2922_v5  ;;  %v2925_v13 = vadd.f32 %v2919_v4, %v2918_v56 }
 0x96b   : > { %2926 = vadd.xlane.f32.xlu1 %v2925_v13 }
 0x9f6   : > { %v2924_v41 = vpop.xlane.xlu0 %2923 }
 0x9f7   : > { %v2928_v57 = vmul.f32 0.00390625, %v2924_v41 }
 0x9f8   : > { %v2927_v10 = vpop.xlane.xlu1 %2926 }
 0x9f9   : > { %v2930_v14 = vsub.f32 %v2916_v63, %v2928_v57  ;;  %v2931_v12 = vsub.f32 %v2917_v2, %v2928_v57  ;;  %v2929_v16 = vmul.f32 0.00390625, %v2927_v10 }
 0x9fb   : > { %v2932_v7 = vsub.f32 %v2918_v56, %v2929_v16  ;;  %v2933_v11 = vsub.f32 %v2919_v4, %v2929_v16  ;;  %v2934_v15 = vmul.f32 %v2930_v14, %v2930_v14  ;;  %v2935_v17 = vmul.f32 %v2931_v12, %v2931_v12 }
 0x9fd   : > { %v2938_v6 = vadd.f32 %v2935_v17, %v2934_v15  ;;  %v2936_v18 = vmul.f32 %v2932_v7, %v2932_v7  ;;  %v2937_v19 = vmul.f32 %v2933_v11, %v2933_v11 }
 0x9ff   : > { %2939 = vadd.xlane.f32.xlu0 %v2938_v6  ;;  %v2941_v8 = vadd.f32 %v2937_v19, %v2936_v18 }
 0xa01   : > { %2942 = vadd.xlane.f32.xlu1 %v2941_v8 }
 0xa8c   : > { %v2940_v9 = vpop.xlane.xlu0 %2939 }
 0xa8d   : > { %v2944_v20 = vmul.f32 0.00390625, %v2940_v9 }
 0xa8e   : > { %v2943_v21 = vpop.xlane.xlu1 %2942 }
 0xa8f   : > { %v2946_v22 = vadd.f32 1e-05, %v2944_v20  ;;  %v2945_v23 = vmul.f32 0.00390625, %v2943_v21 }
 0xa91   : > { %3980 = vrsqrt.f32 %v2946_v22  ;;  %v2947_v24 = vadd.f32 1e-05, %v2945_v23 }
 0xa93   : > { %3982 = vrsqrt.f32 %v2947_v24 }
 0xa9b   : > { %v3981_v29 = vpop.eup %3980 }
 0xa9c   : > { %v2950_v32 = vmul.f32 %v3981_v29, %v2930_v14  ;;  %v2951_v33 = vmul.f32 %v3981_v29, %v2931_v12 }
 0xa9d   : > { %v3983_v34 = vpop.eup %3982 }
 0xa9e   : > { %v2965_v35 = vmul.f32 %v2958_v27, %v2950_v32  ;;  %v2966_v36 = vmul.f32 %v2962_v28, %v2951_v33  ;;  %v2952_v37 = vmul.f32 %v3983_v34, %v2932_v7  ;;  %v2953_v38 = vmul.f32 %v3983_v34, %v2933_v11 }
 0xaa0   : > { %v2980_v40 = vadd.f32 %v2973_v30, %v2965_v35  ;;  %v2981_v43 = vadd.f32 %v2977_v31, %v2966_v36  ;;  %v2967_v44 = vmul.f32 %v2958_v27, %v2952_v37  ;;  %v2968_v45 = vmul.f32 %v2962_v28, %v2953_v38 }
 0xaa2   : > { %2984 = vst [vmem:[%s583_s26] sm:$0xff] %v2980_v40  ;;  %2985 = vst [vmem:[%s583_s26 + $0x8] sm:$0xff] %v2981_v43  ;;  %v2982_v42 = vadd.f32 %v2973_v30, %v2967_v44  ;;  %v2983_v39 = vadd.f32 %v2977_v31, %v2968_v45 }
 0xaa4   : > { %2986 = vst [vmem:[%s583_s26 + $0x10] sm:$0xff] %v2982_v42  ;;  %2987 = vst [vmem:[%s583_s26 + $0x18] sm:$0xff] %v2983_v39 }
 0xaa5   : > { %4173 = shalt.err (!%p4170_p8)
}
 0xaa6   : > { %s4174_s0 = scalar_lea.hbm %s4783_s8, 512  ;;  %s4178_s7 = scalar_lea.hbm %s4896_s27, 1024 }
 0xaa7   : > { %p4175_p11 = scmp.ne.s32.totalorder %s4783_s8, %s4174_s0  ;;  %p4179_p2 = scmp.lt.u32.totalorder %s4783_s8, %s4896_s27 }
 0xaa8   : > { %p4180_p1 = scmp.lt.u32.totalorder %s4178_s7, %s4174_s0  ;;  %p4182_p0 = scmp.lt.u32.totalorder %s4174_s0, %s4783_s8 }
 0xaa9   : > { %p4176_p7 = pnand %p4175_p11, %p4504_p10 }
 0xaaa   : > { %p4181_p13 = por %p4180_p1, %p4179_p2 }
 0xaab   : > { %p4177_p12 = pneg %p4176_p7 }
 0xaac   : > { %p4183_p4 = por %p4182_p0, %p4181_p13 }
 0xaae   : > { %p4184_p6 = pnand %p4183_p4, %p4177_p12 }
 0xab0   : > { %4187 = shalt.err (!%p4184_p6)
}
 0xab1   : > { %s4262_s20 = smov 256   ;;  %s4263_s9 = smov 16  }
 0xab2   : > { %3491 = dma.vmem_to_hbm [thread:$0]  (%p4504_p10), %s4785_s4, 512, %s4783_s8, %s2989_s17, %s4262_s20, %s4262_s20, %s4263_s9  }
 0xab3 PF: > { %s4897_s26 = sld [smem:[#allocation20_spill]]  ;;  %s4898_s28 = sld [smem:[#allocation21_spill]] }
 0xab4   : > { %p4900_p5 = scmp.ge.s32.totalorder %s4242_s16, 2 }
 0xab9   : > { %s3017_s14 = sand.u32 1, %s4897_s26   ;;  %p4899_p3 = scmp.ne.s32.totalorder %s4898_s28, 0 }
 0xaba   : > { %s3018_s13 = scalar_lea.sflag [#allocation4], %s3017_s14 }
 0xabb   : > { %p3514_p9 = pnand %p4900_p5, %p4899_p3 }
 0xabd   : > { %4225 = dma.done.wait (!%p3514_p9), %s3018_s13, 512  }
 0xabe   : > { %4227 = vsyncadd (!%p3514_p9), %s3018_s13, 4294966784  ;;  %s4901_s18 = smov %s4494_s29  ;;  %p32_p8 = scmp.ge.s32.totalorder %s4494_s29, 4  }
 0xabf   : > { %s4902_s29 = smov %s4234_s30  ;;  %s4903_s30 = smov %s4238_s15 }
 0xac0   : > { %s4904_s15 = smov %s4510_s25  ;;  %s4905_s16 = smov %s4901_s18 }
 0xac1   :  { %34 = sbr.rel (!%p32_p8) target bundleno = 20 (0x14), region = 150 }
 0xac8   :  { %3023 = vsyncpa [#allocation3], 1 }
 0xac9   :  { %3025 = vsyncpa [#allocation3 + $0x1], 1 }
 0xaca   :  { %3026 = vsyncpa [#allocation6], 1 }
 0xacb   :  { %3028 = vsyncpa [#allocation6 + $0x1], 1 }
 0xacc   :  { %3029 = vsyncpa [#allocation9], 1 }
 0xacd   :  { %3030 = vsyncpa [#allocation12], 1 }
 0xace   :  { %3031 = vsyncpa [#allocation4], 1 }
 0xacf   :  { %3033 = vsyncpa [#allocation4 + $0x1], 1 }

</bundles_post_ra>
